<compile_context>
chip_gen: v7x
topology: tpu7x:2x2x1
jax: 0.10.0
libtpu: 0.0.40
codegen_flags: <defaults>
</compile_context>

<pallas_src>
import functools

import jax
import jax.numpy as jnp
from jax.experimental import pallas as pl
from jax.experimental.pallas import tpu as pltpu

IN_FEATURES = 3099
HIDDEN = 250
HIDDEN_PAD = 256          # 250 -> 2 * 128 lanes (zero padding, math unchanged)
OUT_FEATURES = 2

DEFAULT_BLOCK_B = 1024            # f32-safe on v7x (64 MiB VMEM); grow on v5e/v6e
VMEM_LIMIT_BYTES = 48 << 20       # fits every generation; raise to ~96 MiB on v5e/v6e


def _round_up(n, m):
    return (n + m - 1) // m * m


def _mlp_kernel(x_ref, w1_ref, b1_ref, w2_ref, b2_ref, o_ref):
    # One batch tile: fc1 -> ReLU -> fc2 -> sigmoid.
    # x arrives in its native dtype; cast to the matmul operand dtype here
    # (in-VMEM VPU cast — no extra HBM pass, unlike a wrapper-side cast).
    x = x_ref[...].astype(w1_ref.dtype)
    # fc1 on the MXU with f32 accumulation; K=3099 tail tile is masked by Mosaic.
    h = jnp.dot(x, w1_ref[...], preferred_element_type=jnp.float32)
    h = jnp.maximum(h + b1_ref[...], 0.0)
    # fc2 (+bias, sigmoid): <0.1% of FLOPs; sigmoid lands on the otherwise idle EUP.
    z = jnp.dot(h, w2_ref[...], preferred_element_type=jnp.float32)
    o_ref[...] = jax.nn.sigmoid(z + b2_ref[...])


def prepare_params(w1, b1, w2, b2, *, dtype=jnp.float32):
    """Pad / cast the parameters ONCE (hoisted out of the per-forward call).

    w1: (3099, 250) = fc1.weight.T, b1: (250,) or (1, 250)
    w2: (250, 2)    = fc2.weight.T, b2: (2,)   or (1, 2)
    `dtype` is the MXU operand dtype for fc1 (f32 or bf16); biases and fc2 stay f32.
    """
    w1p = jnp.pad(w1.astype(jnp.float32),
                  ((0, 0), (0, HIDDEN_PAD - HIDDEN))).astype(dtype)
    b1p = jnp.pad(b1.astype(jnp.float32).reshape(1, HIDDEN),
                  ((0, 0), (0, HIDDEN_PAD - HIDDEN)))
    w2p = jnp.pad(w2.astype(jnp.float32),
                  ((0, HIDDEN_PAD - HIDDEN), (0, 0)))
    b2p = b2.astype(jnp.float32).reshape(1, OUT_FEATURES)
    return w1p, b1p, w2p, b2p


@functools.partial(jax.jit, static_argnames=("block_b",))
def fully_connected_nn(x, w1p, b1p, w2p, b2p, *, block_b=DEFAULT_BLOCK_B):
    """Forward pass of FullyConnectedNN.

    x    : (B, 3099), any float dtype (cast in-kernel, matching xb.float())
    w1p..: outputs of prepare_params()
    returns (B, 2) float32
    """
    B = x.shape[0]
    compute_dtype = w1p.dtype

    # Batch tile: full vreg packing (16 sublanes for bf16, 8 for f32).
    mult = 16 if compute_dtype == jnp.bfloat16 else 8
    blk = _round_up(block_b, mult)
    tb = B if B <= blk else blk          # tb == B (full-dim block) or an aligned tile
    grid = (pl.cdiv(B, tb),)             # ragged last block: padded read, masked write

    cost = pl.CostEstimate(
        flops=2 * B * IN_FEATURES * HIDDEN_PAD + 2 * B * HIDDEN_PAD * OUT_FEATURES,
        transcendentals=B * OUT_FEATURES,
        bytes_accessed=(B * IN_FEATURES * x.dtype.itemsize       # x (dominant)
                        + w1p.size * w1p.dtype.itemsize          # W1
                        + (b1p.size + w2p.size + b2p.size) * 4   # b1, W2, b2
                        + B * OUT_FEATURES * 4),                 # out
    )

    const = lambda i: (0, 0)  # weights: same block every step -> VMEM-resident
    out = pl.pallas_call(
        _mlp_kernel,
        out_shape=jax.ShapeDtypeStruct((B, OUT_FEATURES), jnp.float32),
        grid=grid,
        in_specs=[
            # x: streamed per batch tile in its NATIVE dtype (double-buffered).
            # Last block dim == full array dim (3099) is legal; cast happens in-kernel.
            pl.BlockSpec((tb, IN_FEATURES), lambda i: (i, 0)),
            # Weights / biases: constant index -> resident; single-buffered
            # (second pipeline buffer would never be used -> frees ~3.2 MB VMEM).
            pl.BlockSpec((IN_FEATURES, HIDDEN_PAD), const, pipeline_mode=pl.Buffered(1)),
            pl.BlockSpec((1, HIDDEN_PAD), const, pipeline_mode=pl.Buffered(1)),
            pl.BlockSpec((HIDDEN_PAD, OUT_FEATURES), const, pipeline_mode=pl.Buffered(1)),
            pl.BlockSpec((1, OUT_FEATURES), const, pipeline_mode=pl.Buffered(1)),
        ],
        # OUT=2 left unpadded: output bytes are ~0.06% of x bytes, masked vst is free.
        out_specs=pl.BlockSpec((tb, OUT_FEATURES), lambda i: (i, 0)),
        compiler_params=pltpu.CompilerParams(
            dimension_semantics=("parallel",),   # shards batch tiles across TCs on v7x
            vmem_limit_bytes=VMEM_LIMIT_BYTES,
        ),
        cost_estimate=cost,
    )(x, w1p, b1p, w2p, b2p)
    return out


def _init_params(key):
    """Deterministic init mimicking PyTorch nn.Linear default U[-1/sqrt(fan_in), ...]."""
    k1, k2, k3, k4 = jax.random.split(key, 4)
    bound1 = 1.0 / (IN_FEATURES ** 0.5)
    bound2 = 1.0 / (HIDDEN ** 0.5)
    w1 = jax.random.uniform(k1, (IN_FEATURES, HIDDEN), jnp.float32, -bound1, bound1)
    b1 = jax.random.uniform(k2, (1, HIDDEN), jnp.float32, -bound1, bound1)
    w2 = jax.random.uniform(k3, (HIDDEN, OUT_FEATURES), jnp.float32, -bound2, bound2)
    b2 = jax.random.uniform(k4, (1, OUT_FEATURES), jnp.float32, -bound2, bound2)
    return w1, b1, w2, b2


if __name__ == "__main__":
    key = jax.random.PRNGKey(0)
    kx, kp = jax.random.split(key)

    B = 8
    x = jax.random.normal(kx, (B, IN_FEATURES), jnp.float32)
    w1, b1, w2, b2 = _init_params(kp)
    ref = jax.nn.sigmoid(jnp.maximum(x @ w1 + b1, 0.0) @ w2 + b2)

    # f32 path (exact PyTorch xb.float() semantics). Weights prepared once, reused.
    pf32 = prepare_params(w1, b1, w2, b2, dtype=jnp.float32)
    out = jax.block_until_ready(fully_connected_nn(x, *pf32))
    assert out.shape == (B, OUT_FEATURES)
    assert out.dtype == jnp.float32
    assert bool(jnp.all((out >= 0.0) & (out <= 1.0)))
    assert bool(jnp.allclose(out, ref, atol=1e-5, rtol=1e-5))

    # Ragged batch (B not a multiple of the tile): exercises the padded last
    # block read + masked writeback path (no jnp.pad of x anywhere).
    B2 = 20
    x2 = jax.random.normal(kx, (B2, IN_FEATURES), jnp.float32)
    ref2 = jax.nn.sigmoid(jnp.maximum(x2 @ w1 + b1, 0.0) @ w2 + b2)
    out2 = jax.block_until_ready(fully_connected_nn(x2, *pf32, block_b=8))
    assert out2.shape == (B2, OUT_FEATURES)
    assert bool(jnp.allclose(out2, ref2, atol=1e-5, rtol=1e-5))

    # bf16-operand inference path (f32 accumulation): caller supplies bf16
    # activations so the dominant HBM stream is halved; looser tolerance.
    pbf16 = prepare_params(w1, b1, w2, b2, dtype=jnp.bfloat16)
    out_bf = jax.block_until_ready(
        fully_connected_nn(x.astype(jnp.bfloat16), *pbf16))
    assert bool(jnp.allclose(out_bf, ref, atol=5e-2, rtol=5e-2))

    print("KERNEL_OK")
</pallas_src>

<mosaic_0001>
module attributes {stable_mosaic.version = 11 : i64} {
  func.func @_mlp_kernel(%arg0: i32, %arg1: memref<8x3099xf32, #tpu.memory_space<vmem>>, %arg2: memref<3099x256xf32, #tpu.memory_space<vmem>>, %arg3: memref<1x256xf32, #tpu.memory_space<vmem>>, %arg4: memref<256x2xf32, #tpu.memory_space<vmem>>, %arg5: memref<1x2xf32, #tpu.memory_space<vmem>>, %arg6: memref<8x2xf32, #tpu.memory_space<vmem>>) attributes {dimension_semantics = [#tpu.dimension_semantics<parallel>], iteration_bounds = array<i64: 1>, scalar_prefetch = 0 : i64, scratch_operands = 0 : i64, tpu.core_type = #tpu.core_type<tc>, window_params = [{transform_indices = @transform_0, window_bounds = array<i64: 8, 3099>}, {pipeline_mode = #tpu.pipeline_mode<synchronous>, transform_indices = @transform_1, window_bounds = array<i64: 3099, 256>}, {pipeline_mode = #tpu.pipeline_mode<synchronous>, transform_indices = @transform_2, window_bounds = array<i64: 1, 256>}, {pipeline_mode = #tpu.pipeline_mode<synchronous>, transform_indices = @transform_3, window_bounds = array<i64: 256, 2>}, {pipeline_mode = #tpu.pipeline_mode<synchronous>, transform_indices = @transform_4, window_bounds = array<i64: 1, 2>}, {transform_indices = @transform_5, window_bounds = array<i64: 8, 2>}]} {
    %c0 = arith.constant 0 : index
    %c0_0 = arith.constant 0 : index
    %0 = vector.load %arg1[%c0, %c0_0] : memref<8x3099xf32, #tpu.memory_space<vmem>>, vector<8x3099xf32>
    %c0_1 = arith.constant 0 : index
    %c0_2 = arith.constant 0 : index
    %1 = vector.load %arg2[%c0_1, %c0_2] : memref<3099x256xf32, #tpu.memory_space<vmem>>, vector<3099x256xf32>
    %cst = arith.constant dense<0.000000e+00> : vector<8x256xf32>
    %2 = tpu.matmul %0, %1, %cst {dimension_numbers = #tpu.dot_dimension_numbers<[1], [0], [0], [1], [0, 0, 1, 1], [], []>} : vector<8x3099xf32>, vector<3099x256xf32>, vector<8x256xf32> -> vector<8x256xf32>
    %c0_3 = arith.constant 0 : index
    %c0_4 = arith.constant 0 : index
    %3 = vector.load %arg3[%c0_3, %c0_4] : memref<1x256xf32, #tpu.memory_space<vmem>>, vector<1x256xf32>
    %4 = vector.broadcast %3 : vector<1x256xf32> to vector<8x256xf32>
    %5 = arith.addf %2, %4 : vector<8x256xf32>
    %cst_5 = arith.constant 0.000000e+00 : f32
    %6 = vector.broadcast %cst_5 : f32 to vector<8x256xf32>
    %7 = arith.maximumf %5, %6 : vector<8x256xf32>
    %c0_6 = arith.constant 0 : index
    %c0_7 = arith.constant 0 : index
    %8 = vector.load %arg4[%c0_6, %c0_7] : memref<256x2xf32, #tpu.memory_space<vmem>>, vector<256x2xf32>
    %cst_8 = arith.constant dense<0.000000e+00> : vector<8x2xf32>
    %9 = tpu.matmul %7, %8, %cst_8 {dimension_numbers = #tpu.dot_dimension_numbers<[1], [0], [0], [1], [0, 0, 1, 1], [], []>} : vector<8x256xf32>, vector<256x2xf32>, vector<8x2xf32> -> vector<8x2xf32>
    %c0_9 = arith.constant 0 : index
    %c0_10 = arith.constant 0 : index
    %10 = vector.load %arg5[%c0_9, %c0_10] : memref<1x2xf32, #tpu.memory_space<vmem>>, vector<1x2xf32>
    %11 = vector.broadcast %10 : vector<1x2xf32> to vector<8x2xf32>
    %12 = arith.addf %9, %11 : vector<8x2xf32>
    %13 = arith.negf %12 : vector<8x2xf32>
    %14 = math.exp %13 : vector<8x2xf32>
    %cst_11 = arith.constant 1.000000e+00 : f32
    %15 = vector.broadcast %cst_11 : f32 to vector<8x2xf32>
    %16 = arith.addf %15, %14 : vector<8x2xf32>
    %17 = arith.divf %15, %16 : vector<8x2xf32>
    %c0_12 = arith.constant 0 : index
    %c0_13 = arith.constant 0 : index
    %18 = vector.load %arg6[%c0_12, %c0_13] : memref<8x2xf32, #tpu.memory_space<vmem>>, vector<8x2xf32>
    tpu.vector_store %arg6[%c0_12, %c0_13], %17 {strides = array<i32>} : memref<8x2xf32, #tpu.memory_space<vmem>>, vector<8x2xf32>,
    return
  }
  func.func @transform_0(%arg0: i32) -> (i32, i32) {
    %c0_i32 = arith.constant 0 : i32
    %c0_i32_0 = arith.constant 0 : i32
    return %arg0, %c0_i32 : i32, i32
  }
  func.func @transform_1(%arg0: i32) -> (i32, i32) {
    %c0_i32 = arith.constant 0 : i32
    %c0_i32_0 = arith.constant 0 : i32
    %c0_i32_1 = arith.constant 0 : i32
    return %c0_i32, %c0_i32_0 : i32, i32
  }
  func.func @transform_2(%arg0: i32) -> (i32, i32) {
    %c0_i32 = arith.constant 0 : i32
    %c0_i32_0 = arith.constant 0 : i32
    %c0_i32_1 = arith.constant 0 : i32
    return %c0_i32, %c0_i32_0 : i32, i32
  }
  func.func @transform_3(%arg0: i32) -> (i32, i32) {
    %c0_i32 = arith.constant 0 : i32
    %c0_i32_0 = arith.constant 0 : i32
    %c0_i32_1 = arith.constant 0 : i32
    return %c0_i32, %c0_i32_0 : i32, i32
  }
  func.func @transform_4(%arg0: i32) -> (i32, i32) {
    %c0_i32 = arith.constant 0 : i32
    %c0_i32_0 = arith.constant 0 : i32
    %c0_i32_1 = arith.constant 0 : i32
    return %c0_i32, %c0_i32_0 : i32, i32
  }
  func.func @transform_5(%arg0: i32) -> (i32, i32) {
    %c0_i32 = arith.constant 0 : i32
    %c0_i32_0 = arith.constant 0 : i32
    return %arg0, %c0_i32 : i32, i32
  }
}

</mosaic_0001>

<bundles_post_ra>
// kernel: fully_connected_nn.1
= control target key start
LH: loop header
LB: loop body
LE: loop exit
PB: predicated region body
PF: predicated region fallthrough
CT: control target
= control target key end

     0   :  { %10 = vsyncpa [#allocation3], 0  ;;  %s3118_s0 = inlined_call_operand.hbm [shape: f32[8,3099], index: 0, kind: input, shape index: {}]   ;;  %s3119_s1 = inlined_call_operand.hbm [shape: f32[3099,256], index: 1, kind: input, shape index: {}]   ;;  %s3120_s2 = inlined_call_operand.hbm [shape: f32[1,256], index: 2, kind: input, shape index: {}]   ;;  %s3121_s3 = inlined_call_operand.vmem [shape: f32[256,2], index: 3, kind: input, shape index: {}]   ;;  %s3122_s4 = inlined_call_operand.hbm [shape: f32[1,2], index: 4, kind: input, shape index: {}]   ;;  %s3123_s5 = inlined_call_operand.vmem [shape: f32[8,2], index: 5, kind: output, shape index: {}]  }
   0x1   :  { %11 = vsyncpa [#allocation5], 0 }
   0x2   :  { %12 = vsyncpa [#allocation8], 0  ;;  %s2924_s18 = smov [#allocation4]   ;;  %s2830_s22 = scalar_lea.hbm %s3119_s1, 99328 }
   0x3   :  { %s28_s19 = sshll.u32 %s2924_s18, 4  ;;  %p2831_p0 = scmp.ne.s32.totalorder %s3119_s1, %s2830_s22  ;;  %s29_s19 = int_to_ptr.vmem [resolvable:$true] %s28_s19 }
   0x4   :  { %p2834_p1 = scmp.lt.u32.totalorder %s2830_s22, %s3119_s1 }
   0x6   :  { %p2836_p2 = pnand %p2834_p1, %p2831_p0 }
   0x8   :  { %2839 = shalt.err (!%p2836_p2)
}
   0x9   :  { %s2840_s27 = scalar_lea.vmem %s29_s19, 99328  ;;  %p2845_p4 = scmp.lt.s32.totalorder %s29_s19, %s29_s19 }
   0xa   :  { %p2841_p3 = scmp.ne.s32.totalorder %s29_s19, %s2840_s27  ;;  %p2846_p5 = scmp.lt.s32.totalorder %s2840_s27, %s2840_s27 }
   0xc   :  { %p2847_p6 = por %p2846_p5, %p2845_p4 }
   0xe   :  { %p2848_p7 = pnand %p2847_p6, %p2841_p3 }
  0x10   :  { %2851 = shalt.err (!%p2848_p7)
}
  0x11   :  { %s2925_s28 = smov 256   ;;  %s2926_s29 = smov 16  }
  0x12   :  { %34 = dma.hbm_to_vmem [thread:$0]  %s3119_s1, 99328, %s29_s19, [#allocation5], %s2925_s28, %s2925_s28, %s2926_s29  }
  0x13   :  { %s2927_s7 = smov [#allocation2]   ;;  %s2928_s9 = smov [#allocation6]  }
  0x14   :  { %s19_s8 = sshll.u32 %s2927_s7, 4  ;;  %s41_s10 = sshll.u32 %s2928_s9, 4  ;;  %s20_s8 = int_to_ptr.vmem [resolvable:$true] %s19_s8  ;;  %s42_s10 = int_to_ptr.vmem [resolvable:$true] %s41_s10 }
  0x15   :  { %s2852_s13 = scalar_lea.hbm %s3118_s0, 3200 }
  0x16   :  { %p2853_p8 = scmp.ne.s32.totalorder %s3118_s0, %s2852_s13  ;;  %p2856_p9 = scmp.lt.u32.totalorder %s2852_s13, %s3118_s0 }
  0x18   :  { %p2858_p10 = pnand %p2856_p9, %p2853_p8 }
  0x1a   :  { %2861 = shalt.err (!%p2858_p10)
}
  0x1b   :  { %s2862_s1 = scalar_lea.vmem %s20_s8, 3200  ;;  %p2867_p12 = scmp.lt.s32.totalorder %s20_s8, %s20_s8 }
  0x1c   :  { %p2863_p11 = scmp.ne.s32.totalorder %s20_s8, %s2862_s1  ;;  %p2868_p13 = scmp.lt.s32.totalorder %s2862_s1, %s2862_s1 }
  0x1e   :  { %p2869_p0 = por %p2868_p13, %p2867_p12 }
  0x20   :  { %p2870_p1 = pnand %p2869_p0, %p2863_p11 }
  0x22   :  { %2873 = shalt.err (!%p2870_p1)
}
  0x23   :  { %22 = dma.hbm_to_vmem [thread:$0]  %s3118_s0, 3200, %s20_s8, [#allocation3]  }
  0x24   :  { %s2874_s22 = scalar_lea.hbm %s3120_s2, 32 }
  0x25   :  { %p2875_p2 = scmp.ne.s32.totalorder %s3120_s2, %s2874_s22  ;;  %p2878_p3 = scmp.lt.u32.totalorder %s2874_s22, %s3120_s2 }
  0x27   :  { %p2880_p4 = pnand %p2878_p3, %p2875_p2 }
  0x29   :  { %2883 = shalt.err (!%p2880_p4)
}
  0x2a   :  { %s2884_s27 = scalar_lea.vmem %s42_s10, 32  ;;  %p2889_p6 = scmp.lt.s32.totalorder %s42_s10, %s42_s10 }
  0x2b   :  { %p2885_p5 = scmp.ne.s32.totalorder %s42_s10, %s2884_s27  ;;  %p2890_p7 = scmp.lt.s32.totalorder %s2884_s27, %s2884_s27 }
  0x2d   :  { %p2891_p8 = por %p2890_p7, %p2889_p6 }
  0x2f   :  { %p2892_p9 = pnand %p2891_p8, %p2885_p5 }
  0x31   :  { %2895 = shalt.err (!%p2892_p9)
}
  0x32   :  { %44 = dma.hbm_to_vmem [thread:$0]  %s3120_s2, 32, %s42_s10, [#allocation5]  }
  0x33   :  { %s2929_s29 = smov [#allocation7]   ;;  %s2896_s8 = scalar_lea.hbm %s3122_s4, 16 }
  0x34   :  { %s53_s30 = sshll.u32 %s2929_s29, 4  ;;  %p2897_p10 = scmp.ne.s32.totalorder %s3122_s4, %s2896_s8  ;;  %s54_s30 = int_to_ptr.vmem [resolvable:$true] %s53_s30 }
  0x35   :  { %p2900_p11 = scmp.lt.u32.totalorder %s2896_s8, %s3122_s4 }
  0x37   :  { %p2902_p12 = pnand %p2900_p11, %p2897_p10 }
  0x39   :  { %2905 = shalt.err (!%p2902_p12)
}
  0x3a   :  { %s2906_s14 = scalar_lea.vmem %s54_s30, 16  ;;  %s2910_s2 = scalar_lea.vmem %s54_s30, 32 }
  0x3b   :  { %p2907_p13 = scmp.ne.s32.totalorder %s54_s30, %s2906_s14  ;;  %p2911_p0 = scmp.lt.s32.totalorder %s54_s30, %s54_s30 }
  0x3c   :  { %p2912_p1 = scmp.lt.s32.totalorder %s2910_s2, %s2906_s14 }
  0x3e   :  { %p2913_p2 = por %p2912_p1, %p2911_p0 }
  0x40   :  { %p2914_p3 = pnand %p2913_p2, %p2907_p13 }
  0x42   :  { %2917 = shalt.err (!%p2914_p3)
}
  0x43   :  { %56 = dma.hbm_to_vmem [thread:$0]  %s3122_s4, 16, %s54_s30, [#allocation8]  }
  0x44   :  { %2918 = dma.done.wait [#allocation3], 3200  }
  0x45   :  { %2919 = vsyncadd [#allocation3], 4294964096 }
  0x46   :  { %2920 = dma.done.wait [#allocation5], 99360  }
  0x47   :  { %2921 = vsyncadd [#allocation5], 4294867936 }
  0x48   :  { %2922 = dma.done.wait [#allocation8], 16  }
  0x49   :  { %2923 = vsyncadd [#allocation8], 4294967280  ;;  %v95_v0 = vld [vmem:[#allocation4 + $0x8] sm:$0xff]  ;;  %v97_v1 = vld [vmem:[#allocation4 + $0x18] sm:$0xff]  ;;  %vm886_vm0 = vcmask 1042432   ;;  %vm2930_vm1 = vmmov 1  }
  0x4a   :  { %v479_v2 = vld [vmem:[#allocation4 + $0xc08] sm:$0xff]  ;;  %v1982_v3 = vpack.c.bf16 %v97_v1, %v95_v0  ;;  %v481_v4 = vld [vmem:[#allocation4 + $0xc18] sm:$0xff]  ;;  %v94_v5 = vld [vmem:[#allocation4] sm:$0xff]  ;;  %vm882_vm3 = vcmask 220160   ;;  %vm1933_vm4 = vcmask 15360  }
  0x4b   :  { %v96_v6 = vld [vmem:[#allocation4 + $0x10] sm:$0xff]  ;;  %v2366_v7 = vpack.c.bf16 %v481_v4, %v479_v2  ;;  %v478_v9 = vld [vmem:[#allocation4 + $0xc00] sm:$0xff]  ;;  %v99_v11 = vld [vmem:[#allocation4 + $0x28] sm:$0xff] }
  0x4c   :  { %v1984_v8 = vpack.c.bf16 %v96_v6, %v94_v5  ;;  %v480_v10 = vld [vmem:[#allocation4 + $0xc10] sm:$0xff]  ;;  %1983 = vmatprep.subr.bf16.mxu1 %v1982_v3  ;;  %v101_v13 = vld [vmem:[#allocation4 + $0x38] sm:$0xff]  ;;  %v483_v14 = vld [vmem:[#allocation4 + $0xc28] sm:$0xff] }
  0x4d   :  { %v2368_v12 = vpack.c.bf16 %v480_v10, %v478_v9  ;;  %v485_v15 = vld [vmem:[#allocation4 + $0xc38] sm:$0xff]  ;;  %2367 = vmatprep.subr.bf16.mxu0 %v2366_v7  ;;  %v1986_v16 = vpack.c.bf16 %v101_v13, %v99_v11  ;;  %v98_v18 = vld [vmem:[#allocation4 + $0x20] sm:$0xff]  ;;  %v100_v19 = vld [vmem:[#allocation4 + $0x30] sm:$0xff] }
  0x4e   :  { %1985 = vmatpush1.bf16.msra.mxu1 %v1984_v8  ;;  %v2370_v17 = vpack.c.bf16 %v485_v15, %v483_v14  ;;  %v482_v20 = vld [vmem:[#allocation4 + $0xc20] sm:$0xff]  ;;  %v1988_v21 = vpack.c.bf16 %v100_v19, %v98_v18  ;;  %v484_v22 = vld [vmem:[#allocation4 + $0xc30] sm:$0xff]  ;;  %v103_v23 = vld [vmem:[#allocation4 + $0x48] sm:$0xff] }
  0x4f   :  { %2369 = vmatpush1.bf16.msra.mxu0 %v2368_v12  ;;  %v105_v24 = vld [vmem:[#allocation4 + $0x58] sm:$0xff]  ;;  %1987 = vmatprep.subr.bf16.mxu1 %v1986_v16  ;;  %v2372_v25 = vpack.c.bf16 %v484_v22, %v482_v20  ;;  %v487_v27 = vld [vmem:[#allocation4 + $0xc48] sm:$0xff]  ;;  %v102_v29 = vld [vmem:[#allocation4 + $0x40] sm:$0xff] }
  0x50   :  { %2371 = vmatprep.subr.bf16.mxu0 %v2370_v17  ;;  %v1990_v26 = vpack.c.bf16 %v105_v24, %v103_v23  ;;  %v489_v28 = vld [vmem:[#allocation4 + $0xc58] sm:$0xff]  ;;  %v104_v31 = vld [vmem:[#allocation4 + $0x50] sm:$0xff]  ;;  %v486_v32 = vld [vmem:[#allocation4 + $0xc40] sm:$0xff] }
  0x51   :  { %v2374_v30 = vpack.c.bf16 %v489_v28, %v487_v27  ;;  %v488_v33 = vld [vmem:[#allocation4 + $0xc50] sm:$0xff]  ;;  %v1992_v34 = vpack.c.bf16 %v104_v31, %v102_v29  ;;  %v107_v35 = vld [vmem:[#allocation4 + $0x68] sm:$0xff]  ;;  %v109_v36 = vld [vmem:[#allocation4 + $0x78] sm:$0xff] }
  0x52   :  { %1989 = vmatpush1.bf16.msra.mxu1 %v1988_v21  ;;  %v491_v37 = vld [vmem:[#allocation4 + $0xc68] sm:$0xff]  ;;  %v2376_v38 = vpack.c.bf16 %v488_v33, %v486_v32  ;;  %v1994_v39 = vpack.c.bf16 %v109_v36, %v107_v35  ;;  %v493_v40 = vld [vmem:[#allocation4 + $0xc78] sm:$0xff]  ;;  %v106_v41 = vld [vmem:[#allocation4 + $0x60] sm:$0xff] }
  0x53   :  { %2373 = vmatpush1.bf16.msra.mxu0 %v2372_v25  ;;  %1991 = vmatprep.subr.bf16.mxu1 %v1990_v26  ;;  %v108_v42 = vld [vmem:[#allocation4 + $0x70] sm:$0xff]  ;;  %v2378_v43 = vpack.c.bf16 %v493_v40, %v491_v37  ;;  %v490_v44 = vld [vmem:[#allocation4 + $0xc60] sm:$0xff]  ;;  %v111_v46 = vld [vmem:[#allocation4 + $0x88] sm:$0xff] }
  0x54   :  { %2375 = vmatprep.subr.bf16.mxu0 %v2374_v30  ;;  %v492_v45 = vld [vmem:[#allocation4 + $0xc70] sm:$0xff]  ;;  %v113_v47 = vld [vmem:[#allocation4 + $0x98] sm:$0xff]  ;;  %v495_v48 = vld [vmem:[#allocation4 + $0xc88] sm:$0xff]  ;;  %v1996_v50 = vpack.c.bf16 %v108_v42, %v106_v41 }
  0x55   :  { %v497_v49 = vld [vmem:[#allocation4 + $0xc98] sm:$0xff]  ;;  %v2380_v51 = vpack.c.bf16 %v492_v45, %v490_v44  ;;  %v1998_v52 = vpack.c.bf16 %v113_v47, %v111_v46  ;;  %v110_v53 = vld [vmem:[#allocation4 + $0x80] sm:$0xff]  ;;  %v112_v54 = vld [vmem:[#allocation4 + $0x90] sm:$0xff] }
  0x56   :  { %1993 = vmatpush1.bf16.msra.mxu1 %v1992_v34  ;;  %v494_v55 = vld [vmem:[#allocation4 + $0xc80] sm:$0xff]  ;;  %v2382_v56 = vpack.c.bf16 %v497_v49, %v495_v48  ;;  %v496_v57 = vld [vmem:[#allocation4 + $0xc90] sm:$0xff]  ;;  %v115_v58 = vld [vmem:[#allocation4 + $0xa8] sm:$0xff]  ;;  %v2000_v62 = vpack.c.bf16 %v112_v54, %v110_v53 }
  0x57   :  { %2377 = vmatpush1.bf16.msra.mxu0 %v2376_v38  ;;  %1995 = vmatprep.subr.bf16.mxu1 %v1994_v39  ;;  %v117_v59 = vld [vmem:[#allocation4 + $0xb8] sm:$0xff]  ;;  %v499_v60 = vld [vmem:[#allocation4 + $0xca8] sm:$0xff]  ;;  %v2384_v63 = vpack.c.bf16 %v496_v57, %v494_v55  ;;  %v114_v1 = vld [vmem:[#allocation4 + $0xa0] sm:$0xff] }
  0x58   :  { %2379 = vmatprep.subr.bf16.mxu0 %v2378_v43  ;;  %v501_v61 = vld [vmem:[#allocation4 + $0xcb8] sm:$0xff]  ;;  %v2002_v0 = vpack.c.bf16 %v117_v59, %v115_v58  ;;  %v116_v2 = vld [vmem:[#allocation4 + $0xb0] sm:$0xff]  ;;  %v498_v3 = vld [vmem:[#allocation4 + $0xca0] sm:$0xff] }
  0x59   :  { %v2386_v4 = vpack.c.bf16 %v501_v61, %v499_v60  ;;  %v500_v5 = vld [vmem:[#allocation4 + $0xcb0] sm:$0xff]  ;;  %v119_v6 = vld [vmem:[#allocation4 + $0xc8] sm:$0xff]  ;;  %v121_v7 = vld [vmem:[#allocation4 + $0xd8] sm:$0xff]  ;;  %v2004_v10 = vpack.c.bf16 %v116_v2, %v114_v1 }
  0x5a   :  { %1997 = vmatpush1.bf16.msra.mxu1 %v1996_v50  ;;  %v503_v8 = vld [vmem:[#allocation4 + $0xcc8] sm:$0xff]  ;;  %v505_v9 = vld [vmem:[#allocation4 + $0xcd8] sm:$0xff]  ;;  %v2388_v11 = vpack.c.bf16 %v500_v5, %v498_v3  ;;  %v2006_v12 = vpack.c.bf16 %v121_v7, %v119_v6  ;;  %v118_v13 = vld [vmem:[#allocation4 + $0xc0] sm:$0xff] }
  0x5b   :  { %2381 = vmatpush1.bf16.msra.mxu0 %v2380_v51  ;;  %1999 = vmatprep.subr.bf16.mxu1 %v1998_v52  ;;  %v120_v14 = vld [vmem:[#allocation4 + $0xd0] sm:$0xff]  ;;  %v502_v15 = vld [vmem:[#allocation4 + $0xcc0] sm:$0xff]  ;;  %v2390_v16 = vpack.c.bf16 %v505_v9, %v503_v8  ;;  %v123_v18 = vld [vmem:[#allocation4 + $0xe8] sm:$0xff] }
  0x5c   :  { %2383 = vmatprep.subr.bf16.mxu0 %v2382_v56  ;;  %v504_v17 = vld [vmem:[#allocation4 + $0xcd0] sm:$0xff]  ;;  %v125_v19 = vld [vmem:[#allocation4 + $0xf8] sm:$0xff]  ;;  %v507_v20 = vld [vmem:[#allocation4 + $0xce8] sm:$0xff]  ;;  %v2008_v22 = vpack.c.bf16 %v120_v14, %v118_v13 }
  0x5d   :  { %v509_v21 = vld [vmem:[#allocation4 + $0xcf8] sm:$0xff]  ;;  %v2392_v23 = vpack.c.bf16 %v504_v17, %v502_v15  ;;  %v2010_v24 = vpack.c.bf16 %v125_v19, %v123_v18  ;;  %v122_v25 = vld [vmem:[#allocation4 + $0xe0] sm:$0xff]  ;;  %v124_v26 = vld [vmem:[#allocation4 + $0xf0] sm:$0xff] }
  0x5e   :  { %2001 = vmatpush1.bf16.msra.mxu1 %v2000_v62  ;;  %v506_v27 = vld [vmem:[#allocation4 + $0xce0] sm:$0xff]  ;;  %v2394_v28 = vpack.c.bf16 %v509_v21, %v507_v20  ;;  %v508_v29 = vld [vmem:[#allocation4 + $0xcf0] sm:$0xff]  ;;  %v127_v30 = vld [vmem:[#allocation4 + $0x108] sm:$0xff]  ;;  %v2012_v34 = vpack.c.bf16 %v124_v26, %v122_v25 }
  0x5f   :  { %2385 = vmatpush1.bf16.msra.mxu0 %v2384_v63  ;;  %2003 = vmatprep.subr.bf16.mxu1 %v2002_v0  ;;  %v129_v31 = vld [vmem:[#allocation4 + $0x118] sm:$0xff]  ;;  %v511_v32 = vld [vmem:[#allocation4 + $0xd08] sm:$0xff]  ;;  %v2396_v35 = vpack.c.bf16 %v508_v29, %v506_v27  ;;  %v126_v37 = vld [vmem:[#allocation4 + $0x100] sm:$0xff] }
  0x60   :  { %2387 = vmatprep.subr.bf16.mxu0 %v2386_v4  ;;  %v513_v33 = vld [vmem:[#allocation4 + $0xd18] sm:$0xff]  ;;  %v2014_v36 = vpack.c.bf16 %v129_v31, %v127_v30  ;;  %v128_v38 = vld [vmem:[#allocation4 + $0x110] sm:$0xff]  ;;  %v510_v39 = vld [vmem:[#allocation4 + $0xd00] sm:$0xff] }
  0x61   :  { %v2398_v40 = vpack.c.bf16 %v513_v33, %v511_v32  ;;  %v512_v41 = vld [vmem:[#allocation4 + $0xd10] sm:$0xff]  ;;  %v131_v42 = vld [vmem:[#allocation4 + $0x128] sm:$0xff]  ;;  %v133_v43 = vld [vmem:[#allocation4 + $0x138] sm:$0xff]  ;;  %v2016_v46 = vpack.c.bf16 %v128_v38, %v126_v37 }
  0x62   :  { %2005 = vmatpush1.bf16.msra.mxu1 %v2004_v10  ;;  %v515_v44 = vld [vmem:[#allocation4 + $0xd28] sm:$0xff]  ;;  %v517_v45 = vld [vmem:[#allocation4 + $0xd38] sm:$0xff]  ;;  %v2400_v47 = vpack.c.bf16 %v512_v41, %v510_v39  ;;  %v2018_v48 = vpack.c.bf16 %v133_v43, %v131_v42  ;;  %v130_v49 = vld [vmem:[#allocation4 + $0x120] sm:$0xff] }
  0x63   :  { %2389 = vmatpush1.bf16.msra.mxu0 %v2388_v11  ;;  %2007 = vmatprep.subr.bf16.mxu1 %v2006_v12  ;;  %v132_v50 = vld [vmem:[#allocation4 + $0x130] sm:$0xff]  ;;  %v514_v51 = vld [vmem:[#allocation4 + $0xd20] sm:$0xff]  ;;  %v2402_v52 = vpack.c.bf16 %v517_v45, %v515_v44  ;;  %v135_v54 = vld [vmem:[#allocation4 + $0x148] sm:$0xff] }
  0x64   :  { %2391 = vmatprep.subr.bf16.mxu0 %v2390_v16  ;;  %v516_v53 = vld [vmem:[#allocation4 + $0xd30] sm:$0xff]  ;;  %v137_v55 = vld [vmem:[#allocation4 + $0x158] sm:$0xff]  ;;  %v519_v56 = vld [vmem:[#allocation4 + $0xd48] sm:$0xff]  ;;  %v2020_v58 = vpack.c.bf16 %v132_v50, %v130_v49 }
  0x65   :  { %v521_v57 = vld [vmem:[#allocation4 + $0xd58] sm:$0xff]  ;;  %v2404_v59 = vpack.c.bf16 %v516_v53, %v514_v51  ;;  %v2022_v60 = vpack.c.bf16 %v137_v55, %v135_v54  ;;  %v134_v61 = vld [vmem:[#allocation4 + $0x140] sm:$0xff]  ;;  %v136_v62 = vld [vmem:[#allocation4 + $0x150] sm:$0xff] }
  0x66   :  { %2009 = vmatpush1.bf16.msra.mxu1 %v2008_v22  ;;  %v518_v63 = vld [vmem:[#allocation4 + $0xd40] sm:$0xff]  ;;  %v2406_v0 = vpack.c.bf16 %v521_v57, %v519_v56  ;;  %v520_v1 = vld [vmem:[#allocation4 + $0xd50] sm:$0xff]  ;;  %v139_v2 = vld [vmem:[#allocation4 + $0x168] sm:$0xff]  ;;  %v2024_v6 = vpack.c.bf16 %v136_v62, %v134_v61 }
  0x67   :  { %2393 = vmatpush1.bf16.msra.mxu0 %v2392_v23  ;;  %2011 = vmatprep.subr.bf16.mxu1 %v2010_v24  ;;  %v141_v3 = vld [vmem:[#allocation4 + $0x178] sm:$0xff]  ;;  %v523_v4 = vld [vmem:[#allocation4 + $0xd68] sm:$0xff]  ;;  %v138_v7 = vld [vmem:[#allocation4 + $0x160] sm:$0xff]  ;;  %v2408_v8 = vpack.c.bf16 %v520_v1, %v518_v63 }
  0x68   :  { %2395 = vmatprep.subr.bf16.mxu0 %v2394_v28  ;;  %v525_v5 = vld [vmem:[#allocation4 + $0xd78] sm:$0xff]  ;;  %v2026_v9 = vpack.c.bf16 %v141_v3, %v139_v2  ;;  %v140_v10 = vld [vmem:[#allocation4 + $0x170] sm:$0xff]  ;;  %v522_v11 = vld [vmem:[#allocation4 + $0xd60] sm:$0xff] }
  0x69   :  { %v524_v12 = vld [vmem:[#allocation4 + $0xd70] sm:$0xff]  ;;  %v2410_v13 = vpack.c.bf16 %v525_v5, %v523_v4  ;;  %v143_v14 = vld [vmem:[#allocation4 + $0x188] sm:$0xff]  ;;  %v145_v15 = vld [vmem:[#allocation4 + $0x198] sm:$0xff]  ;;  %v2028_v20 = vpack.c.bf16 %v140_v10, %v138_v7 }
  0x6a   :  { %2013 = vmatpush1.bf16.msra.mxu1 %v2012_v34  ;;  %v70_v16 = vld [vmem:[#allocation2 + $0x8] sm:$0xff]  ;;  %v527_v17 = vld [vmem:[#allocation4 + $0xd88] sm:$0xff]  ;;  %v529_v18 = vld [vmem:[#allocation4 + $0xd98] sm:$0xff]  ;;  %v2412_v21 = vpack.c.bf16 %v524_v12, %v522_v11  ;;  %v2030_v22 = vpack.c.bf16 %v145_v15, %v143_v14 }
  0x6b   :  { %2397 = vmatpush1.bf16.msra.mxu0 %v2396_v35  ;;  %2015 = vmatprep.subr.bf16.mxu1 %v2014_v36  ;;  %v82_v19 = vld [vmem:[#allocation2 + $0x68] sm:$0xff]  ;;  %v144_v24 = vld [vmem:[#allocation4 + $0x190] sm:$0xff]  ;;  %v2414_v26 = vpack.c.bf16 %v529_v18, %v527_v17  ;;  %v147_v28 = vld [vmem:[#allocation4 + $0x1a8] sm:$0xff] }
  0x6c   :  { %2399 = vmatprep.subr.bf16.mxu0 %v2398_v40  ;;  %957 = vmatprep.mubr.f32.mxu1 %v70_v16  ;;  %v142_v23 = vld [vmem:[#allocation4 + $0x180] sm:$0xff]  ;;  %v528_v27 = vld [vmem:[#allocation4 + $0xd90] sm:$0xff]  ;;  %v149_v29 = vld [vmem:[#allocation4 + $0x1b8] sm:$0xff] }
  0x6d   :  { %1383 = vmatprep.mubr.f32.mxu0 %v82_v19  ;;  %v526_v25 = vld [vmem:[#allocation4 + $0xd80] sm:$0xff]  ;;  %v531_v30 = vld [vmem:[#allocation4 + $0xda8] sm:$0xff]  ;;  %v533_v31 = vld [vmem:[#allocation4 + $0xdb8] sm:$0xff]  ;;  %v2032_v32 = vpack.c.bf16 %v144_v24, %v142_v23  ;;  %v2034_v34 = vpack.c.bf16 %v149_v29, %v147_v28 }
  0x6e   :  { %2017 = vmatpush1.bf16.msra.mxu1 %v2016_v46  ;;  %v2416_v33 = vpack.c.bf16 %v528_v27, %v526_v25  ;;  %v146_v35 = vld [vmem:[#allocation4 + $0x1a0] sm:$0xff]  ;;  %v148_v36 = vld [vmem:[#allocation4 + $0x1b0] sm:$0xff]  ;;  %v2418_v38 = vpack.c.bf16 %v533_v31, %v531_v30  ;;  %v151_v40 = vld [vmem:[#allocation4 + $0x1c8] sm:$0xff] }
  0x6f   :  { %2401 = vmatpush1.bf16.msra.mxu0 %v2400_v47  ;;  %2019 = vmatprep.subr.bf16.mxu1 %v2018_v48  ;;  %v530_v37 = vld [vmem:[#allocation4 + $0xda0] sm:$0xff]  ;;  %v532_v39 = vld [vmem:[#allocation4 + $0xdb0] sm:$0xff]  ;;  %v153_v41 = vld [vmem:[#allocation4 + $0x1d8] sm:$0xff]  ;;  %v2036_v44 = vpack.c.bf16 %v148_v36, %v146_v35 }
  0x70   :  { %2403 = vmatprep.subr.bf16.mxu0 %v2402_v52  ;;  %v535_v42 = vld [vmem:[#allocation4 + $0xdc8] sm:$0xff]  ;;  %v537_v43 = vld [vmem:[#allocation4 + $0xdd8] sm:$0xff]  ;;  %v2420_v45 = vpack.c.bf16 %v532_v39, %v530_v37  ;;  %v2038_v46 = vpack.c.bf16 %v153_v41, %v151_v40  ;;  %v150_v47 = vld [vmem:[#allocation4 + $0x1c0] sm:$0xff] }
  0x71   :  { %v152_v48 = vld [vmem:[#allocation4 + $0x1d0] sm:$0xff]  ;;  %v534_v49 = vld [vmem:[#allocation4 + $0xdc0] sm:$0xff]  ;;  %v2422_v50 = vpack.c.bf16 %v537_v43, %v535_v42  ;;  %v155_v52 = vld [vmem:[#allocation4 + $0x1e8] sm:$0xff] }
  0x72   :  { %2021 = vmatpush1.bf16.msra.mxu1 %v2020_v58  ;;  %v536_v51 = vld [vmem:[#allocation4 + $0xdd0] sm:$0xff]  ;;  %v157_v53 = vld [vmem:[#allocation4 + $0x1f8] sm:$0xff]  ;;  %v539_v54 = vld [vmem:[#allocation4 + $0xde8] sm:$0xff]  ;;  %v2040_v56 = vpack.c.bf16 %v152_v48, %v150_v47 }
  0x73   :  { %2405 = vmatpush1.bf16.msra.mxu0 %v2404_v59  ;;  %2023 = vmatprep.subr.bf16.mxu1 %v2022_v60  ;;  %v541_v55 = vld [vmem:[#allocation4 + $0xdf8] sm:$0xff]  ;;  %v2424_v57 = vpack.c.bf16 %v536_v51, %v534_v49  ;;  %v2042_v58 = vpack.c.bf16 %v157_v53, %v155_v52  ;;  %v154_v59 = vld [vmem:[#allocation4 + $0x1e0] sm:$0xff]  ;;  %v156_v60 = vld [vmem:[#allocation4 + $0x1f0] sm:$0xff] }
  0x74   :  { %2407 = vmatprep.subr.bf16.mxu0 %v2406_v0  ;;  %v538_v61 = vld [vmem:[#allocation4 + $0xde0] sm:$0xff]  ;;  %v2426_v62 = vpack.c.bf16 %v541_v55, %v539_v54  ;;  %v540_v63 = vld [vmem:[#allocation4 + $0xdf0] sm:$0xff]  ;;  %v159_v0 = vld [vmem:[#allocation4 + $0x208] sm:$0xff]  ;;  %v2044_v4 = vpack.c.bf16 %v156_v60, %v154_v59 }
  0x75   :  { %v161_v1 = vld [vmem:[#allocation4 + $0x218] sm:$0xff]  ;;  %v543_v2 = vld [vmem:[#allocation4 + $0xe08] sm:$0xff]  ;;  %v2428_v5 = vpack.c.bf16 %v540_v63, %v538_v61  ;;  %v158_v7 = vld [vmem:[#allocation4 + $0x200] sm:$0xff] }
  0x76   :  { %2025 = vmatpush1.bf16.msra.mxu1 %v2024_v6  ;;  %v545_v3 = vld [vmem:[#allocation4 + $0xe18] sm:$0xff]  ;;  %v2046_v6 = vpack.c.bf16 %v161_v1, %v159_v0  ;;  %v544_v11 = vld [vmem:[#allocation4 + $0xe10] sm:$0xff]  ;;  %v163_v12 = vld [vmem:[#allocation4 + $0x228] sm:$0xff] }
  0x77   :  { %2409 = vmatpush1.bf16.msra.mxu0 %v2408_v8  ;;  %2027 = vmatprep.subr.bf16.mxu1 %v2026_v9  ;;  %v160_v8 = vld [vmem:[#allocation4 + $0x210] sm:$0xff]  ;;  %v542_v9 = vld [vmem:[#allocation4 + $0xe00] sm:$0xff]  ;;  %v2430_v10 = vpack.c.bf16 %v545_v3, %v543_v2  ;;  %v547_v14 = vld [vmem:[#allocation4 + $0xe28] sm:$0xff] }
  0x78   :  { %2411 = vmatprep.subr.bf16.mxu0 %v2410_v13  ;;  %v165_v13 = vld [vmem:[#allocation4 + $0x238] sm:$0xff]  ;;  %v2048_v17 = vpack.c.bf16 %v160_v8, %v158_v7  ;;  %v2432_v19 = vpack.c.bf16 %v544_v11, %v542_v9  ;;  %v546_v23 = vld [vmem:[#allocation4 + $0xe20] sm:$0xff]  ;;  %v548_v25 = vld [vmem:[#allocation4 + $0xe30] sm:$0xff] }
  0x79   :  { %v549_v15 = vld [vmem:[#allocation4 + $0xe38] sm:$0xff]  ;;  %v551_v28 = vld [vmem:[#allocation4 + $0xe48] sm:$0xff]  ;;  %v2436_v31 = vpack.c.bf16 %v548_v25, %v546_v23  ;;  %v550_v35 = vld [vmem:[#allocation4 + $0xe40] sm:$0xff] }
  0x7a   :  { %2029 = vmatpush1.bf16.msra.mxu1 %v2028_v20  ;;  %v69_v16 = vld [vmem:[#allocation2] sm:$0xff]  ;;  %v2050_v20 = vpack.c.bf16 %v165_v13, %v163_v12  ;;  %v2434_v24 = vpack.c.bf16 %v549_v15, %v547_v14  ;;  %v552_v37 = vld [vmem:[#allocation4 + $0xe50] sm:$0xff]  ;;  %v555_v40 = vld [vmem:[#allocation4 + $0xe68] sm:$0xff] }
  0x7b   :  { %2413 = vmatpush1.bf16.msra.mxu0 %v2412_v21  ;;  %2031 = vmatprep.subr.bf16.mxu1 %v2030_v22  ;;  %v81_v18 = vld [vmem:[#allocation2 + $0x60] sm:$0xff]  ;;  %v162_v21 = vld [vmem:[#allocation4 + $0x220] sm:$0xff]  ;;  %v164_v22 = vld [vmem:[#allocation4 + $0x230] sm:$0xff]  ;;  %v2440_v43 = vpack.c.bf16 %v552_v37, %v550_v35 }
  0x7c   :  { %2415 = vmatprep.subr.bf16.mxu0 %v2414_v26  ;;  %v167_v26 = vld [vmem:[#allocation4 + $0x248] sm:$0xff]  ;;  %v169_v27 = vld [vmem:[#allocation4 + $0x258] sm:$0xff]  ;;  %v2052_v30 = vpack.c.bf16 %v164_v22, %v162_v21  ;;  %v554_v47 = vld [vmem:[#allocation4 + $0xe60] sm:$0xff] }
  0x7d   :  { %v553_v29 = vld [vmem:[#allocation4 + $0xe58] sm:$0xff]  ;;  %v556_v49 = vld [vmem:[#allocation4 + $0xe70] sm:$0xff]  ;;  %v559_v52 = vld [vmem:[#allocation4 + $0xe88] sm:$0xff] }
  0x7e   :  { %2033 = vmatpush1.bf16.msra.mxu1 %v2032_v32  ;;  %v2054_v32 = vpack.c.bf16 %v169_v27, %v167_v26  ;;  %v2438_v36 = vpack.c.bf16 %v553_v29, %v551_v28  ;;  %v173_v39 = vld [vmem:[#allocation4 + $0x278] sm:$0xff]  ;;  %v2444_v55 = vpack.c.bf16 %v556_v49, %v554_v47  ;;  %v558_v59 = vld [vmem:[#allocation4 + $0xe80] sm:$0xff]  ;;  %v560_v61 = vld [vmem:[#allocation4 + $0xe90] sm:$0xff] }
  0x7f   :  { %2417 = vmatpush1.bf16.msra.mxu0 %v2416_v33  ;;  %2035 = vmatprep.subr.bf16.mxu1 %v2034_v34  ;;  %v166_v33 = vld [vmem:[#allocation4 + $0x240] sm:$0xff]  ;;  %v168_v34 = vld [vmem:[#allocation4 + $0x250] sm:$0xff]  ;;  %v557_v41 = vld [vmem:[#allocation4 + $0xe78] sm:$0xff]  ;;  %v2448_v3 = vpack.c.bf16 %v560_v61, %v558_v59 }
  0x80   :  { %2419 = vmatprep.subr.bf16.mxu0 %v2418_v38  ;;  %v171_v38 = vld [vmem:[#allocation4 + $0x268] sm:$0xff]  ;;  %v2056_v42 = vpack.c.bf16 %v168_v34, %v166_v33  ;;  %v2442_v48 = vpack.c.bf16 %v557_v41, %v555_v40  ;;  %v177_v51 = vld [vmem:[#allocation4 + $0x298] sm:$0xff]  ;;  %v562_v7 = vld [vmem:[#allocation4 + $0xea0] sm:$0xff] }
  0x81   :  { %v561_v53 = vld [vmem:[#allocation4 + $0xe98] sm:$0xff]  ;;  %v563_v0 = vld [vmem:[#allocation4 + $0xea8] sm:$0xff]  ;;  %v564_v9 = vld [vmem:[#allocation4 + $0xeb0] sm:$0xff] }
  0x82   :  { %2037 = vmatpush1.bf16.msra.mxu1 %v2036_v44  ;;  %v2058_v44 = vpack.c.bf16 %v173_v39, %v171_v38  ;;  %v2446_v60 = vpack.c.bf16 %v561_v53, %v559_v52  ;;  %v181_v63 = vld [vmem:[#allocation4 + $0x2b8] sm:$0xff]  ;;  %v567_v12 = vld [vmem:[#allocation4 + $0xec8] sm:$0xff]  ;;  %v182_v15 = vld [vmem:[#allocation4 + $0x2c0] sm:$0xff] }
  0x83   :  { %2421 = vmatpush1.bf16.msra.mxu0 %v2420_v45  ;;  %2039 = vmatprep.subr.bf16.mxu1 %v2038_v46  ;;  %v170_v45 = vld [vmem:[#allocation4 + $0x260] sm:$0xff]  ;;  %v172_v46 = vld [vmem:[#allocation4 + $0x270] sm:$0xff]  ;;  %v565_v1 = vld [vmem:[#allocation4 + $0xeb8] sm:$0xff] }
  0x84   :  { %2423 = vmatprep.subr.bf16.mxu0 %v2422_v50  ;;  %v175_v50 = vld [vmem:[#allocation4 + $0x288] sm:$0xff]  ;;  %v2060_v54 = vpack.c.bf16 %v172_v46, %v170_v45  ;;  %v2450_v8 = vpack.c.bf16 %v565_v1, %v563_v0  ;;  %v185_v11 = vld [vmem:[#allocation4 + $0x2d8] sm:$0xff]  ;;  %v84_v27 = vld [vmem:[#allocation2 + $0x78] sm:$0xff] }
  0x85   :  { %v569_v13 = vld [vmem:[#allocation4 + $0xed8] sm:$0xff]  ;;  %v187_v22 = vld [vmem:[#allocation4 + $0x2e8] sm:$0xff]  ;;  %v570_v33 = vld [vmem:[#allocation4 + $0xee0] sm:$0xff] }
  0x86   :  { %2041 = vmatpush1.bf16.msra.mxu1 %v2040_v56  ;;  %v2062_v56 = vpack.c.bf16 %v177_v51, %v175_v50  ;;  %v2454_v21 = vpack.c.bf16 %v569_v13, %v567_v12  ;;  %v189_v23 = vld [vmem:[#allocation4 + $0x2f8] sm:$0xff]  ;;  %v571_v25 = vld [vmem:[#allocation4 + $0xee8] sm:$0xff]  ;;  %v572_v35 = vld [vmem:[#allocation4 + $0xef0] sm:$0xff] }
  0x87   :  { %2425 = vmatpush1.bf16.msra.mxu0 %v2424_v57  ;;  %2043 = vmatprep.subr.bf16.mxu1 %v2042_v58  ;;  %v174_v57 = vld [vmem:[#allocation4 + $0x280] sm:$0xff]  ;;  %v176_v58 = vld [vmem:[#allocation4 + $0x290] sm:$0xff]  ;;  %v573_v26 = vld [vmem:[#allocation4 + $0xef8] sm:$0xff]  ;;  %v2460_v41 = vpack.c.bf16 %v572_v35, %v570_v33 }
  0x88   :  { %2427 = vmatprep.subr.bf16.mxu0 %v2426_v62  ;;  %v179_v62 = vld [vmem:[#allocation4 + $0x2a8] sm:$0xff]  ;;  %v2064_v2 = vpack.c.bf16 %v176_v58, %v174_v57  ;;  %v2458_v34 = vpack.c.bf16 %v573_v26, %v571_v25  ;;  %v193_v37 = vld [vmem:[#allocation4 + $0x318] sm:$0xff]  ;;  %v574_v45 = vld [vmem:[#allocation4 + $0xf00] sm:$0xff] }
  0x89   :  { %v575_v38 = vld [vmem:[#allocation4 + $0xf08] sm:$0xff]  ;;  %v577_v39 = vld [vmem:[#allocation4 + $0xf18] sm:$0xff]  ;;  %v576_v47 = vld [vmem:[#allocation4 + $0xf10] sm:$0xff] }
  0x8a   :  { %2045 = vmatpush1.bf16.msra.mxu1 %v2044_v4  ;;  %v2066_v4 = vpack.c.bf16 %v181_v63, %v179_v62  ;;  %v2462_v46 = vpack.c.bf16 %v577_v39, %v575_v38  ;;  %v197_v49 = vld [vmem:[#allocation4 + $0x338] sm:$0xff]  ;;  %v579_v50 = vld [vmem:[#allocation4 + $0xf28] sm:$0xff]  ;;  %v2464_v53 = vpack.c.bf16 %v576_v47, %v574_v45  ;;  %v578_v57 = vld [vmem:[#allocation4 + $0xf20] sm:$0xff] }
  0x8b   :  { %2429 = vmatpush1.bf16.msra.mxu0 %v2428_v5  ;;  %2047 = vmatprep.subr.bf16.mxu1 %v2046_v6  ;;  %v178_v5 = vld [vmem:[#allocation4 + $0x2a0] sm:$0xff]  ;;  %v180_v6 = vld [vmem:[#allocation4 + $0x2b0] sm:$0xff]  ;;  %v581_v51 = vld [vmem:[#allocation4 + $0xf38] sm:$0xff] }
  0x8c   :  { %2431 = vmatprep.subr.bf16.mxu0 %v2430_v10  ;;  %v183_v10 = vld [vmem:[#allocation4 + $0x2c8] sm:$0xff]  ;;  %v2068_v14 = vpack.c.bf16 %v180_v6, %v178_v5  ;;  %v2466_v58 = vpack.c.bf16 %v581_v51, %v579_v50  ;;  %v580_v59 = vld [vmem:[#allocation4 + $0xf30] sm:$0xff]  ;;  %v201_v61 = vld [vmem:[#allocation4 + $0x358] sm:$0xff] }
  0x8d   :  { %958 = vmatmul.mubr.f32.vlgmr.msra.gmra.mrb[0].mxu1 %v69_v16  ;;  %v2452_v16 = vpack.c.bf16 %v564_v9, %v562_v7  ;;  %v583_v62 = vld [vmem:[#allocation4 + $0xf48] sm:$0xff]  ;;  %v585_v63 = vld [vmem:[#allocation4 + $0xf58] sm:$0xff]  ;;  %v2468_v1 = vpack.c.bf16 %v580_v59, %v578_v57  ;;  %v582_v5 = vld [vmem:[#allocation4 + $0xf40] sm:$0xff] }
  0x8e   :  { %2049 = vmatpush1.bf16.msra.mxu1 %v2048_v17  ;;  %1384 = vmatmul.mubr.f32.vlgmr.msra.gmra.mrb[0].mxu0 %v81_v18  ;;  %v2070_v17 = vpack.c.bf16 %v185_v11, %v183_v10  ;;  %v184_v18 = vld [vmem:[#allocation4 + $0x2d0] sm:$0xff]  ;;  %v2470_v6 = vpack.c.bf16 %v585_v63, %v583_v62  ;;  %v205_v9 = vld [vmem:[#allocation4 + $0x378] sm:$0xff]  ;;  %v587_v10 = vld [vmem:[#allocation4 + $0xf68] sm:$0xff] }
  0x8f   :  { %2433 = vmatpush1.bf16.msra.mxu0 %v2432_v19  ;;  %2051 = vmatprep.subr.bf16.mxu1 %v2050_v20  ;;  %v566_v19 = vld [vmem:[#allocation4 + $0xec0] sm:$0xff]  ;;  %v568_v20 = vld [vmem:[#allocation4 + $0xed0] sm:$0xff]  ;;  %v2072_v28 = vpack.c.bf16 %v184_v18, %v182_v15  ;;  %v589_v11 = vld [vmem:[#allocation4 + $0xf78] sm:$0xff] }
  0x90   :  { %2435 = vmatprep.subr.bf16.mxu0 %v2434_v24  ;;  %v72_v24 = vld [vmem:[#allocation2 + $0x18] sm:$0xff]  ;;  %1454 = vmatprep.mubr.f32.mxu0 %v84_v27  ;;  %v2456_v29 = vpack.c.bf16 %v568_v20, %v566_v19  ;;  %v202_v15 = vld [vmem:[#allocation4 + $0x360] sm:$0xff]  ;;  %v2474_v18 = vpack.c.bf16 %v589_v11, %v587_v10  ;;  %v207_v20 = vld [vmem:[#allocation4 + $0x388] sm:$0xff] }
  0x91   :  { %1028 = vmatprep.mubr.f32.mxu1 %v72_v24  ;;  %v584_v7 = vld [vmem:[#allocation4 + $0xf50] sm:$0xff]  ;;  %v206_v27 = vld [vmem:[#allocation4 + $0x380] sm:$0xff]  ;;  %v213_v33 = vld [vmem:[#allocation4 + $0x3b8] sm:$0xff] }
  0x92   :  { %2053 = vmatpush1.bf16.msra.mxu1 %v2052_v30  ;;  %v2074_v30 = vpack.c.bf16 %v189_v23, %v187_v22  ;;  %v2472_v13 = vpack.c.bf16 %v584_v7, %v582_v5  ;;  %v588_v19 = vld [vmem:[#allocation4 + $0xf70] sm:$0xff]  ;;  %v591_v22 = vld [vmem:[#allocation4 + $0xf88] sm:$0xff]  ;;  %v593_v23 = vld [vmem:[#allocation4 + $0xf98] sm:$0xff] }
  0x93   :  { %2437 = vmatpush1.bf16.msra.mxu0 %v2436_v31  ;;  %2055 = vmatprep.subr.bf16.mxu1 %v2054_v32  ;;  %v186_v31 = vld [vmem:[#allocation4 + $0x2e0] sm:$0xff]  ;;  %v188_v32 = vld [vmem:[#allocation4 + $0x2f0] sm:$0xff]  ;;  %v597_v35 = vld [vmem:[#allocation4 + $0xfb8] sm:$0xff] }
  0x94   :  { %2439 = vmatprep.subr.bf16.mxu0 %v2438_v36  ;;  %v191_v36 = vld [vmem:[#allocation4 + $0x308] sm:$0xff]  ;;  %v2076_v40 = vpack.c.bf16 %v188_v32, %v186_v31  ;;  %v592_v31 = vld [vmem:[#allocation4 + $0xf90] sm:$0xff]  ;;  %v210_v39 = vld [vmem:[#allocation4 + $0x3a0] sm:$0xff] }
  0x95   :  { %v211_v32 = vld [vmem:[#allocation4 + $0x3a8] sm:$0xff]  ;;  %v217_v45 = vld [vmem:[#allocation4 + $0x3d8] sm:$0xff]  ;;  %v214_v51 = vld [vmem:[#allocation4 + $0x3c0] sm:$0xff] }
  0x96   :  { %2057 = vmatpush1.bf16.msra.mxu1 %v2056_v42  ;;  %v2078_v42 = vpack.c.bf16 %v193_v37, %v191_v36  ;;  %v2098_v38 = vpack.c.bf16 %v213_v33, %v211_v32  ;;  %v601_v47 = vld [vmem:[#allocation4 + $0xfd8] sm:$0xff]  ;;  %v218_v63 = vld [vmem:[#allocation4 + $0x3e0] sm:$0xff]  ;;  %v615_v32 = vld [vmem:[#allocation4 + $0x1048] sm:$0xff] }
  0x97   :  { %2441 = vmatpush1.bf16.msra.mxu0 %v2440_v43  ;;  %2059 = vmatprep.subr.bf16.mxu1 %v2058_v44  ;;  %v190_v43 = vld [vmem:[#allocation4 + $0x300] sm:$0xff]  ;;  %v192_v44 = vld [vmem:[#allocation4 + $0x310] sm:$0xff]  ;;  %v221_v57 = vld [vmem:[#allocation4 + $0x3f8] sm:$0xff] }
  0x98   :  { %2443 = vmatprep.subr.bf16.mxu0 %v2442_v48  ;;  %v195_v48 = vld [vmem:[#allocation4 + $0x328] sm:$0xff]  ;;  %v2080_v52 = vpack.c.bf16 %v192_v44, %v190_v43  ;;  %v596_v43 = vld [vmem:[#allocation4 + $0xfb0] sm:$0xff]  ;;  %v605_v59 = vld [vmem:[#allocation4 + $0xff8] sm:$0xff] }
  0x99   :  { %v215_v44 = vld [vmem:[#allocation4 + $0x3c8] sm:$0xff]  ;;  %v225_v5 = vld [vmem:[#allocation4 + $0x418] sm:$0xff]  ;;  %v222_v11 = vld [vmem:[#allocation4 + $0x400] sm:$0xff] }
  0x9a   :  { %2061 = vmatpush1.bf16.msra.mxu1 %v2060_v54  ;;  %v2082_v54 = vpack.c.bf16 %v197_v49, %v195_v48  ;;  %v2102_v50 = vpack.c.bf16 %v217_v45, %v215_v44  ;;  %v609_v7 = vld [vmem:[#allocation4 + $0x1018] sm:$0xff]  ;;  %v235_v44 = vld [vmem:[#allocation4 + $0x468] sm:$0xff]  ;;  %vm3041_vm2 = vmpackc.low %vm886_vm0, %vm2930_vm1 }
  0x9b   :  { %2445 = vmatpush1.bf16.msra.mxu0 %v2444_v55  ;;  %2063 = vmatprep.subr.bf16.mxu1 %v2062_v56  ;;  %v194_v55 = vld [vmem:[#allocation4 + $0x320] sm:$0xff]  ;;  %v196_v56 = vld [vmem:[#allocation4 + $0x330] sm:$0xff]  ;;  %v617_v33 = vld [vmem:[#allocation4 + $0x1058] sm:$0xff] }
  0x9c   :  { %2447 = vmatprep.subr.bf16.mxu0 %v2446_v60  ;;  %v199_v60 = vld [vmem:[#allocation4 + $0x348] sm:$0xff]  ;;  %v2084_v0 = vpack.c.bf16 %v196_v56, %v194_v55  ;;  %v600_v55 = vld [vmem:[#allocation4 + $0xfd0] sm:$0xff]  ;;  %v237_v45 = vld [vmem:[#allocation4 + $0x478] sm:$0xff] }
  0x9d   :  { %v219_v56 = vld [vmem:[#allocation4 + $0x3e8] sm:$0xff] }
  0x9e   :  { %2065 = vmatpush1.bf16.msra.mxu1 %v2064_v2  ;;  %v2086_v2 = vpack.c.bf16 %v201_v61, %v199_v60  ;;  %v2106_v62 = vpack.c.bf16 %v221_v57, %v219_v56  ;;  %v239_v56 = vld [vmem:[#allocation4 + $0x488] sm:$0xff]  ;;  %v241_v57 = vld [vmem:[#allocation4 + $0x498] sm:$0xff] }
  0x9f   :  { %2449 = vmatpush1.bf16.msra.mxu0 %v2448_v3  ;;  %2067 = vmatprep.subr.bf16.mxu1 %v2066_v4  ;;  %v198_v3 = vld [vmem:[#allocation4 + $0x340] sm:$0xff]  ;;  %v200_v4 = vld [vmem:[#allocation4 + $0x350] sm:$0xff] }
  0xa0   :  { %2451 = vmatprep.subr.bf16.mxu0 %v2450_v8  ;;  %v203_v8 = vld [vmem:[#allocation4 + $0x368] sm:$0xff]  ;;  %v2088_v12 = vpack.c.bf16 %v200_v4, %v198_v3  ;;  %v604_v3 = vld [vmem:[#allocation4 + $0xff0] sm:$0xff] }
  0xa1   :  { %v223_v4 = vld [vmem:[#allocation4 + $0x408] sm:$0xff] }
  0xa2   :  { %2069 = vmatpush1.bf16.msra.mxu1 %v2068_v14  ;;  %v2090_v14 = vpack.c.bf16 %v205_v9, %v203_v8  ;;  %v2110_v10 = vpack.c.bf16 %v225_v5, %v223_v4  ;;  %v243_v4 = vld [vmem:[#allocation4 + $0x4a8] sm:$0xff]  ;;  %v245_v5 = vld [vmem:[#allocation4 + $0x4b8] sm:$0xff] }
  0xa3   :  { %2453 = vmatpush1.bf16.msra.mxu0 %v2452_v16  ;;  %2071 = vmatprep.subr.bf16.mxu1 %v2070_v17  ;;  %v204_v16 = vld [vmem:[#allocation4 + $0x370] sm:$0xff]  ;;  %v586_v17 = vld [vmem:[#allocation4 + $0xf60] sm:$0xff] }
  0xa4   :  { %2455 = vmatprep.subr.bf16.mxu0 %v2454_v21  ;;  %v209_v21 = vld [vmem:[#allocation4 + $0x398] sm:$0xff]  ;;  %v2092_v24 = vpack.c.bf16 %v204_v16, %v202_v15  ;;  %v2476_v25 = vpack.c.bf16 %v588_v19, %v586_v17  ;;  %v608_v15 = vld [vmem:[#allocation4 + $0x1010] sm:$0xff]  ;;  %v227_v16 = vld [vmem:[#allocation4 + $0x428] sm:$0xff] }
  0xa5   :  { %v2094_v26 = vpack.c.bf16 %v209_v21, %v207_v20  ;;  %v229_v17 = vld [vmem:[#allocation4 + $0x438] sm:$0xff]  ;;  %v71_v20 = vld [vmem:[#allocation2 + $0x10] sm:$0xff] }
  0xa6   :  { %2073 = vmatpush1.bf16.msra.mxu1 %v2072_v28  ;;  %v208_v28 = vld [vmem:[#allocation4 + $0x390] sm:$0xff]  ;;  %v613_v19 = vld [vmem:[#allocation4 + $0x1038] sm:$0xff] }
  0xa7   :  { %2457 = vmatpush1.bf16.msra.mxu0 %v2456_v29  ;;  %2075 = vmatprep.subr.bf16.mxu1 %v2074_v30  ;;  %v590_v29 = vld [vmem:[#allocation4 + $0xf80] sm:$0xff]  ;;  %v2478_v30 = vpack.c.bf16 %v593_v23, %v591_v22  ;;  %v2096_v36 = vpack.c.bf16 %v208_v28, %v206_v27  ;;  %v83_v22 = vld [vmem:[#allocation2 + $0x70] sm:$0xff] }
  0xa8   :  { %2459 = vmatprep.subr.bf16.mxu0 %v2458_v34  ;;  %v595_v34 = vld [vmem:[#allocation4 + $0xfa8] sm:$0xff]  ;;  %v2480_v37 = vpack.c.bf16 %v592_v31, %v590_v29  ;;  %v610_v27 = vld [vmem:[#allocation4 + $0x1020] sm:$0xff]  ;;  %v612_v29 = vld [vmem:[#allocation4 + $0x1030] sm:$0xff] }
  0xa9   :  { %v233_v31 = vld [vmem:[#allocation4 + $0x458] sm:$0xff] }
  0xaa   :  { %2077 = vmatpush1.bf16.msra.mxu1 %v2076_v40  ;;  %v212_v40 = vld [vmem:[#allocation4 + $0x3b0] sm:$0xff] }
  0xab   :  { %2461 = vmatpush1.bf16.msra.mxu0 %v2460_v41  ;;  %2079 = vmatprep.subr.bf16.mxu1 %v2078_v42  ;;  %v594_v41 = vld [vmem:[#allocation4 + $0xfa0] sm:$0xff]  ;;  %v2482_v42 = vpack.c.bf16 %v597_v35, %v595_v34  ;;  %v2100_v48 = vpack.c.bf16 %v212_v40, %v210_v39  ;;  %v232_v40 = vld [vmem:[#allocation4 + $0x450] sm:$0xff] }
  0xac   :  { %2463 = vmatprep.subr.bf16.mxu0 %v2462_v46  ;;  %v599_v46 = vld [vmem:[#allocation4 + $0xfc8] sm:$0xff]  ;;  %v2484_v49 = vpack.c.bf16 %v596_v43, %v594_v41  ;;  %v74_v34 = vld [vmem:[#allocation2 + $0x28] sm:$0xff]  ;;  %v616_v43 = vld [vmem:[#allocation4 + $0x1050] sm:$0xff] }
  0xad   :  { %v230_v39 = vld [vmem:[#allocation4 + $0x440] sm:$0xff] }
  0xae   :  { %2081 = vmatpush1.bf16.msra.mxu1 %v2080_v52  ;;  %v216_v52 = vld [vmem:[#allocation4 + $0x3d0] sm:$0xff]  ;;  %v614_v41 = vld [vmem:[#allocation4 + $0x1040] sm:$0xff] }
  0xaf   :  { %2465 = vmatpush1.bf16.msra.mxu0 %v2464_v53  ;;  %2083 = vmatprep.subr.bf16.mxu1 %v2082_v54  ;;  %v598_v53 = vld [vmem:[#allocation4 + $0xfc0] sm:$0xff]  ;;  %v2486_v54 = vpack.c.bf16 %v601_v47, %v599_v46  ;;  %v2104_v60 = vpack.c.bf16 %v216_v52, %v214_v51  ;;  %v619_v46 = vld [vmem:[#allocation4 + $0x1068] sm:$0xff]  ;;  %v621_v47 = vld [vmem:[#allocation4 + $0x1078] sm:$0xff] }
  0xb0   :  { %2467 = vmatprep.subr.bf16.mxu0 %v2466_v58  ;;  %v603_v58 = vld [vmem:[#allocation4 + $0xfe8] sm:$0xff]  ;;  %v2488_v61 = vpack.c.bf16 %v600_v55, %v598_v53  ;;  %v234_v51 = vld [vmem:[#allocation4 + $0x460] sm:$0xff]  ;;  %v236_v52 = vld [vmem:[#allocation4 + $0x470] sm:$0xff] }
  0xb1   :  { %v618_v53 = vld [vmem:[#allocation4 + $0x1060] sm:$0xff]  ;;  %v620_v55 = vld [vmem:[#allocation4 + $0x1070] sm:$0xff] }
  0xb2   :  { %2085 = vmatpush1.bf16.msra.mxu1 %v2084_v0  ;;  %v220_v0 = vld [vmem:[#allocation4 + $0x3f0] sm:$0xff] }
  0xb3   :  { %2469 = vmatpush1.bf16.msra.mxu0 %v2468_v1  ;;  %2087 = vmatprep.subr.bf16.mxu1 %v2086_v2  ;;  %v602_v1 = vld [vmem:[#allocation4 + $0xfe0] sm:$0xff]  ;;  %v2490_v2 = vpack.c.bf16 %v605_v59, %v603_v58  ;;  %v2108_v8 = vpack.c.bf16 %v220_v0, %v218_v63  ;;  %v623_v58 = vld [vmem:[#allocation4 + $0x1088] sm:$0xff]  ;;  %v625_v59 = vld [vmem:[#allocation4 + $0x1098] sm:$0xff] }
  0xb4   :  { %2471 = vmatprep.subr.bf16.mxu0 %v2470_v6  ;;  %v607_v6 = vld [vmem:[#allocation4 + $0x1008] sm:$0xff]  ;;  %v2492_v9 = vpack.c.bf16 %v604_v3, %v602_v1  ;;  %v238_v63 = vld [vmem:[#allocation4 + $0x480] sm:$0xff]  ;;  %v240_v0 = vld [vmem:[#allocation4 + $0x490] sm:$0xff] }
  0xb5   :  { %v622_v1 = vld [vmem:[#allocation4 + $0x1080] sm:$0xff]  ;;  %v624_v3 = vld [vmem:[#allocation4 + $0x1090] sm:$0xff] }
  0xb6   :  { %2089 = vmatpush1.bf16.msra.mxu1 %v2088_v12  ;;  %v224_v12 = vld [vmem:[#allocation4 + $0x410] sm:$0xff] }
  0xb7   :  { %2473 = vmatpush1.bf16.msra.mxu0 %v2472_v13  ;;  %2091 = vmatprep.subr.bf16.mxu1 %v2090_v14  ;;  %v606_v13 = vld [vmem:[#allocation4 + $0x1000] sm:$0xff]  ;;  %v2494_v14 = vpack.c.bf16 %v609_v7, %v607_v6  ;;  %v2112_v21 = vpack.c.bf16 %v224_v12, %v222_v11  ;;  %v627_v6 = vld [vmem:[#allocation4 + $0x10a8] sm:$0xff]  ;;  %v629_v7 = vld [vmem:[#allocation4 + $0x10b8] sm:$0xff] }
  0xb8   :  { %2475 = vmatprep.subr.bf16.mxu0 %v2474_v18  ;;  %v611_v18 = vld [vmem:[#allocation4 + $0x1028] sm:$0xff]  ;;  %v2496_v23 = vpack.c.bf16 %v608_v15, %v606_v13  ;;  %v242_v11 = vld [vmem:[#allocation4 + $0x4a0] sm:$0xff]  ;;  %v244_v12 = vld [vmem:[#allocation4 + $0x4b0] sm:$0xff] }
  0xb9   :  { %v2498_v28 = vpack.c.bf16 %v613_v19, %v611_v18  ;;  %v626_v13 = vld [vmem:[#allocation4 + $0x10a0] sm:$0xff]  ;;  %v628_v15 = vld [vmem:[#allocation4 + $0x10b0] sm:$0xff]  ;;  %v631_v18 = vld [vmem:[#allocation4 + $0x10c8] sm:$0xff] }
  0xba   :  { %2093 = vmatpush1.bf16.msra.mxu1 %v2092_v24  ;;  %v2114_v24 = vpack.c.bf16 %v229_v17, %v227_v16  ;;  %v247_v16 = vld [vmem:[#allocation4 + $0x4c8] sm:$0xff]  ;;  %v249_v17 = vld [vmem:[#allocation4 + $0x4d8] sm:$0xff] }
  0xbb   :  { %2477 = vmatpush1.bf16.msra.mxu0 %v2476_v25  ;;  %2095 = vmatprep.subr.bf16.mxu1 %v2094_v26  ;;  %v226_v25 = vld [vmem:[#allocation4 + $0x420] sm:$0xff]  ;;  %v228_v26 = vld [vmem:[#allocation4 + $0x430] sm:$0xff]  ;;  %v633_v19 = vld [vmem:[#allocation4 + $0x10d8] sm:$0xff] }
  0xbc   :  { %2479 = vmatprep.subr.bf16.mxu0 %v2478_v30  ;;  %v231_v30 = vld [vmem:[#allocation4 + $0x448] sm:$0xff]  ;;  %v2116_v35 = vpack.c.bf16 %v228_v26, %v226_v25  ;;  %v630_v25 = vld [vmem:[#allocation4 + $0x10c0] sm:$0xff]  ;;  %v2518_v26 = vpack.c.bf16 %v633_v19, %v631_v18 }
  0xbd   :  { %v266_v19 = vld [vmem:[#allocation4 + $0x560] sm:$0xff] }
  0xbe   :  { %2097 = vmatpush1.bf16.msra.mxu1 %v2096_v36  ;;  %v86_v36 = vld [vmem:[#allocation2 + $0x88] sm:$0xff] }
  0xbf   :  { %2481 = vmatpush1.bf16.msra.mxu0 %v2480_v37  ;;  %2099 = vmatprep.subr.bf16.mxu1 %v2098_v38  ;;  %v2500_v37 = vpack.c.bf16 %v612_v29, %v610_v27  ;;  %v2118_v38 = vpack.c.bf16 %v233_v31, %v231_v30  ;;  %v632_v27 = vld [vmem:[#allocation4 + $0x10d0] sm:$0xff]  ;;  %v253_v29 = vld [vmem:[#allocation4 + $0x4f8] sm:$0xff]  ;;  %v635_v30 = vld [vmem:[#allocation4 + $0x10e8] sm:$0xff] }
  0xc0   :  { %2483 = vmatprep.subr.bf16.mxu0 %v2482_v42  ;;  %v2502_v42 = vpack.c.bf16 %v617_v33, %v615_v32  ;;  %v637_v31 = vld [vmem:[#allocation4 + $0x10f8] sm:$0xff]  ;;  %v2520_v33 = vpack.c.bf16 %v632_v27, %v630_v25 }
  0xc1   :  { %v273_v25 = vld [vmem:[#allocation4 + $0x598] sm:$0xff] }
  0xc2   :  { %2101 = vmatpush1.bf16.msra.mxu1 %v2100_v48  ;;  %v2120_v48 = vpack.c.bf16 %v232_v40, %v230_v39  ;;  %v636_v39 = vld [vmem:[#allocation4 + $0x10f0] sm:$0xff]  ;;  %v255_v40 = vld [vmem:[#allocation4 + $0x508] sm:$0xff]  ;;  %v657_v27 = vld [vmem:[#allocation4 + $0x1198] sm:$0xff] }
  0xc3   :  { %2485 = vmatpush1.bf16.msra.mxu0 %v2484_v49  ;;  %2103 = vmatprep.subr.bf16.mxu1 %v2102_v50  ;;  %v2504_v49 = vpack.c.bf16 %v616_v43, %v614_v41  ;;  %v2122_v50 = vpack.c.bf16 %v237_v45, %v235_v44  ;;  %v257_v41 = vld [vmem:[#allocation4 + $0x518] sm:$0xff] }
  0xc4   :  { %2487 = vmatprep.subr.bf16.mxu0 %v2486_v54  ;;  %v2506_v54 = vpack.c.bf16 %v621_v47, %v619_v46  ;;  %v641_v43 = vld [vmem:[#allocation4 + $0x1118] sm:$0xff]  ;;  %v2142_v46 = vpack.c.bf16 %v257_v41, %v255_v40  ;;  %v254_v47 = vld [vmem:[#allocation4 + $0x500] sm:$0xff] }
  0xc6   :  { %2105 = vmatpush1.bf16.msra.mxu1 %v2104_v60  ;;  %v2124_v60 = vpack.c.bf16 %v236_v52, %v234_v51  ;;  %v640_v51 = vld [vmem:[#allocation4 + $0x1110] sm:$0xff]  ;;  %v259_v52 = vld [vmem:[#allocation4 + $0x528] sm:$0xff] }
  0xc7   :  { %2489 = vmatpush1.bf16.msra.mxu0 %v2488_v61  ;;  %2107 = vmatprep.subr.bf16.mxu1 %v2106_v62  ;;  %v2508_v61 = vpack.c.bf16 %v620_v55, %v618_v53  ;;  %v2126_v62 = vpack.c.bf16 %v241_v57, %v239_v56  ;;  %v261_v53 = vld [vmem:[#allocation4 + $0x538] sm:$0xff] }
  0xc8   :  { %2491 = vmatprep.subr.bf16.mxu0 %v2490_v2  ;;  %v2510_v2 = vpack.c.bf16 %v625_v59, %v623_v58  ;;  %v645_v55 = vld [vmem:[#allocation4 + $0x1138] sm:$0xff]  ;;  %v2146_v58 = vpack.c.bf16 %v261_v53, %v259_v52  ;;  %v258_v59 = vld [vmem:[#allocation4 + $0x520] sm:$0xff] }
  0xca   :  { %2109 = vmatpush1.bf16.msra.mxu1 %v2108_v8  ;;  %v2128_v8 = vpack.c.bf16 %v240_v0, %v238_v63  ;;  %v644_v63 = vld [vmem:[#allocation4 + $0x1130] sm:$0xff]  ;;  %v263_v0 = vld [vmem:[#allocation4 + $0x548] sm:$0xff] }
  0xcb   :  { %2493 = vmatpush1.bf16.msra.mxu0 %v2492_v9  ;;  %2111 = vmatprep.subr.bf16.mxu1 %v2110_v10  ;;  %v2512_v9 = vpack.c.bf16 %v624_v3, %v622_v1  ;;  %v2130_v10 = vpack.c.bf16 %v245_v5, %v243_v4  ;;  %v265_v1 = vld [vmem:[#allocation4 + $0x558] sm:$0xff] }
  0xcc   :  { %2495 = vmatprep.subr.bf16.mxu0 %v2494_v14  ;;  %v2514_v14 = vpack.c.bf16 %v629_v7, %v627_v6  ;;  %v649_v3 = vld [vmem:[#allocation4 + $0x1158] sm:$0xff]  ;;  %v2150_v6 = vpack.c.bf16 %v265_v1, %v263_v0  ;;  %v262_v7 = vld [vmem:[#allocation4 + $0x540] sm:$0xff] }
  0xcd   :  { %1029 = vmatmul.mubr.f32.vlgmr.msra.gmra.mrb[0].mxu1 %v71_v20  ;;  %v2132_v20 = vpack.c.bf16 %v244_v12, %v242_v11  ;;  %v648_v11 = vld [vmem:[#allocation4 + $0x1150] sm:$0xff]  ;;  %v267_v12 = vld [vmem:[#allocation4 + $0x568] sm:$0xff] }
  0xce   :  { %2113 = vmatpush1.bf16.msra.mxu1 %v2112_v21  ;;  %1455 = vmatmul.mubr.f32.vlgmr.msra.gmra.mrb[0].mxu0 %v83_v22  ;;  %v2516_v21 = vpack.c.bf16 %v628_v15, %v626_v13  ;;  %v2134_v22 = vpack.c.bf16 %v249_v17, %v247_v16  ;;  %v269_v13 = vld [vmem:[#allocation4 + $0x578] sm:$0xff] }
  0xcf   :  { %2497 = vmatpush1.bf16.msra.mxu0 %v2496_v23  ;;  %2115 = vmatprep.subr.bf16.mxu1 %v2114_v24  ;;  %v246_v23 = vld [vmem:[#allocation4 + $0x4c0] sm:$0xff]  ;;  %v248_v24 = vld [vmem:[#allocation4 + $0x4d0] sm:$0xff]  ;;  %v653_v15 = vld [vmem:[#allocation4 + $0x1178] sm:$0xff]  ;;  %v2154_v18 = vpack.c.bf16 %v269_v13, %v267_v12 }
  0xd0   :  { %2499 = vmatprep.subr.bf16.mxu0 %v2498_v28  ;;  %1099 = vmatprep.mubr.f32.mxu1 %v74_v34  ;;  %v251_v28 = vld [vmem:[#allocation4 + $0x4e8] sm:$0xff]  ;;  %v2136_v32 = vpack.c.bf16 %v248_v24, %v246_v23  ;;  %v652_v23 = vld [vmem:[#allocation4 + $0x1170] sm:$0xff] }
  0xd1   :  { %1525 = vmatprep.mubr.f32.mxu0 %v86_v36  ;;  %v2138_v34 = vpack.c.bf16 %v253_v29, %v251_v28  ;;  %v252_v36 = vld [vmem:[#allocation4 + $0x4f0] sm:$0xff]  ;;  %v271_v24 = vld [vmem:[#allocation4 + $0x588] sm:$0xff] }
  0xd2   :  { %2117 = vmatpush1.bf16.msra.mxu1 %v2116_v35  ;;  %v250_v35 = vld [vmem:[#allocation4 + $0x4e0] sm:$0xff] }
  0xd3   :  { %2501 = vmatpush1.bf16.msra.mxu0 %v2500_v37  ;;  %2119 = vmatprep.subr.bf16.mxu1 %v2118_v38  ;;  %v634_v37 = vld [vmem:[#allocation4 + $0x10e0] sm:$0xff]  ;;  %v2522_v38 = vpack.c.bf16 %v637_v31, %v635_v30  ;;  %v2140_v44 = vpack.c.bf16 %v252_v36, %v250_v35  ;;  %v2158_v30 = vpack.c.bf16 %v273_v25, %v271_v24  ;;  %v656_v35 = vld [vmem:[#allocation4 + $0x1190] sm:$0xff]  ;;  %v275_v36 = vld [vmem:[#allocation4 + $0x5a8] sm:$0xff] }
  0xd4   :  { %2503 = vmatprep.subr.bf16.mxu0 %v2502_v42  ;;  %v639_v42 = vld [vmem:[#allocation4 + $0x1108] sm:$0xff]  ;;  %v2524_v45 = vpack.c.bf16 %v636_v39, %v634_v37  ;;  %v270_v31 = vld [vmem:[#allocation4 + $0x580] sm:$0xff]  ;;  %v277_v37 = vld [vmem:[#allocation4 + $0x5b8] sm:$0xff] }
  0xd5   :  { %v661_v39 = vld [vmem:[#allocation4 + $0x11b8] sm:$0xff] }
  0xd6   :  { %2121 = vmatpush1.bf16.msra.mxu1 %v2120_v48  ;;  %v256_v48 = vld [vmem:[#allocation4 + $0x510] sm:$0xff]  ;;  %v73_v24 = vld [vmem:[#allocation2 + $0x20] sm:$0xff] }
  0xd7   :  { %2505 = vmatpush1.bf16.msra.mxu0 %v2504_v49  ;;  %2123 = vmatprep.subr.bf16.mxu1 %v2122_v50  ;;  %v638_v49 = vld [vmem:[#allocation4 + $0x1100] sm:$0xff]  ;;  %v2526_v50 = vpack.c.bf16 %v641_v43, %v639_v42  ;;  %v2144_v56 = vpack.c.bf16 %v256_v48, %v254_v47  ;;  %v2162_v42 = vpack.c.bf16 %v277_v37, %v275_v36  ;;  %v660_v47 = vld [vmem:[#allocation4 + $0x11b0] sm:$0xff]  ;;  %v279_v48 = vld [vmem:[#allocation4 + $0x5c8] sm:$0xff] }
  0xd8   :  { %2507 = vmatprep.subr.bf16.mxu0 %v2506_v54  ;;  %v643_v54 = vld [vmem:[#allocation4 + $0x1128] sm:$0xff]  ;;  %v2528_v57 = vpack.c.bf16 %v640_v51, %v638_v49  ;;  %v274_v43 = vld [vmem:[#allocation4 + $0x5a0] sm:$0xff]  ;;  %v281_v49 = vld [vmem:[#allocation4 + $0x5d8] sm:$0xff] }
  0xd9   :  { %v665_v51 = vld [vmem:[#allocation4 + $0x11d8] sm:$0xff]  ;;  %v679_v36 = vld [vmem:[#allocation4 + $0x1248] sm:$0xff] }
  0xda   :  { %2125 = vmatpush1.bf16.msra.mxu1 %v2124_v60  ;;  %v260_v60 = vld [vmem:[#allocation4 + $0x530] sm:$0xff]  ;;  %v681_v37 = vld [vmem:[#allocation4 + $0x1258] sm:$0xff] }
  0xdb   :  { %2509 = vmatpush1.bf16.msra.mxu0 %v2508_v61  ;;  %2127 = vmatprep.subr.bf16.mxu1 %v2126_v62  ;;  %v642_v61 = vld [vmem:[#allocation4 + $0x1120] sm:$0xff]  ;;  %v2530_v62 = vpack.c.bf16 %v645_v55, %v643_v54  ;;  %v2148_v4 = vpack.c.bf16 %v260_v60, %v258_v59  ;;  %v2166_v54 = vpack.c.bf16 %v281_v49, %v279_v48  ;;  %v664_v59 = vld [vmem:[#allocation4 + $0x11d0] sm:$0xff]  ;;  %v283_v60 = vld [vmem:[#allocation4 + $0x5e8] sm:$0xff] }
  0xdc   :  { %2511 = vmatprep.subr.bf16.mxu0 %v2510_v2  ;;  %v647_v2 = vld [vmem:[#allocation4 + $0x1148] sm:$0xff]  ;;  %v2532_v5 = vpack.c.bf16 %v644_v63, %v642_v61  ;;  %v278_v55 = vld [vmem:[#allocation4 + $0x5c0] sm:$0xff]  ;;  %v285_v61 = vld [vmem:[#allocation4 + $0x5f8] sm:$0xff] }
  0xdd   :  { %v669_v63 = vld [vmem:[#allocation4 + $0x11f8] sm:$0xff]  ;;  %v299_v48 = vld [vmem:[#allocation4 + $0x668] sm:$0xff] }
  0xde   :  { %2129 = vmatpush1.bf16.msra.mxu1 %v2128_v8  ;;  %v264_v8 = vld [vmem:[#allocation4 + $0x550] sm:$0xff]  ;;  %v301_v49 = vld [vmem:[#allocation4 + $0x678] sm:$0xff] }
  0xdf   :  { %2513 = vmatpush1.bf16.msra.mxu0 %v2512_v9  ;;  %2131 = vmatprep.subr.bf16.mxu1 %v2130_v10  ;;  %v646_v9 = vld [vmem:[#allocation4 + $0x1140] sm:$0xff]  ;;  %v2534_v10 = vpack.c.bf16 %v649_v3, %v647_v2  ;;  %v2152_v16 = vpack.c.bf16 %v264_v8, %v262_v7  ;;  %v2170_v2 = vpack.c.bf16 %v285_v61, %v283_v60  ;;  %v668_v7 = vld [vmem:[#allocation4 + $0x11f0] sm:$0xff]  ;;  %v287_v8 = vld [vmem:[#allocation4 + $0x608] sm:$0xff] }
  0xe0   :  { %2515 = vmatprep.subr.bf16.mxu0 %v2514_v14  ;;  %v651_v14 = vld [vmem:[#allocation4 + $0x1168] sm:$0xff]  ;;  %v2536_v17 = vpack.c.bf16 %v648_v11, %v646_v9  ;;  %v282_v3 = vld [vmem:[#allocation4 + $0x5e0] sm:$0xff]  ;;  %v289_v9 = vld [vmem:[#allocation4 + $0x618] sm:$0xff] }
  0xe1   :  { %v673_v11 = vld [vmem:[#allocation4 + $0x1218] sm:$0xff]  ;;  %v303_v60 = vld [vmem:[#allocation4 + $0x688] sm:$0xff] }
  0xe2   :  { %2133 = vmatpush1.bf16.msra.mxu1 %v2132_v20  ;;  %v268_v20 = vld [vmem:[#allocation4 + $0x570] sm:$0xff]  ;;  %v305_v61 = vld [vmem:[#allocation4 + $0x698] sm:$0xff] }
  0xe3   :  { %2517 = vmatpush1.bf16.msra.mxu0 %v2516_v21  ;;  %2135 = vmatprep.subr.bf16.mxu1 %v2134_v22  ;;  %v650_v21 = vld [vmem:[#allocation4 + $0x1160] sm:$0xff]  ;;  %v2538_v22 = vpack.c.bf16 %v653_v15, %v651_v14  ;;  %v2156_v28 = vpack.c.bf16 %v268_v20, %v266_v19  ;;  %v2174_v14 = vpack.c.bf16 %v289_v9, %v287_v8  ;;  %v672_v19 = vld [vmem:[#allocation4 + $0x1210] sm:$0xff]  ;;  %v291_v20 = vld [vmem:[#allocation4 + $0x628] sm:$0xff] }
  0xe4   :  { %2519 = vmatprep.subr.bf16.mxu0 %v2518_v26  ;;  %v655_v26 = vld [vmem:[#allocation4 + $0x1188] sm:$0xff]  ;;  %v2540_v29 = vpack.c.bf16 %v652_v23, %v650_v21  ;;  %v286_v15 = vld [vmem:[#allocation4 + $0x600] sm:$0xff]  ;;  %v293_v21 = vld [vmem:[#allocation4 + $0x638] sm:$0xff] }
  0xe5   :  { %v677_v23 = vld [vmem:[#allocation4 + $0x1238] sm:$0xff]  ;;  %v307_v8 = vld [vmem:[#allocation4 + $0x6a8] sm:$0xff] }
  0xe6   :  { %2137 = vmatpush1.bf16.msra.mxu1 %v2136_v32  ;;  %v272_v32 = vld [vmem:[#allocation4 + $0x590] sm:$0xff]  ;;  %v309_v9 = vld [vmem:[#allocation4 + $0x6b8] sm:$0xff] }
  0xe7   :  { %2521 = vmatpush1.bf16.msra.mxu0 %v2520_v33  ;;  %2139 = vmatprep.subr.bf16.mxu1 %v2138_v34  ;;  %v654_v33 = vld [vmem:[#allocation4 + $0x1180] sm:$0xff]  ;;  %v2542_v34 = vpack.c.bf16 %v657_v27, %v655_v26  ;;  %v2160_v40 = vpack.c.bf16 %v272_v32, %v270_v31  ;;  %v85_v26 = vld [vmem:[#allocation2 + $0x80] sm:$0xff] }
  0xe8   :  { %2523 = vmatprep.subr.bf16.mxu0 %v2522_v38  ;;  %v659_v38 = vld [vmem:[#allocation4 + $0x11a8] sm:$0xff]  ;;  %v2544_v41 = vpack.c.bf16 %v656_v35, %v654_v33  ;;  %v674_v31 = vld [vmem:[#allocation4 + $0x1220] sm:$0xff]  ;;  %v676_v33 = vld [vmem:[#allocation4 + $0x1230] sm:$0xff] }
  0xe9   :  { %v297_v35 = vld [vmem:[#allocation4 + $0x658] sm:$0xff] }
  0xea   :  { %2141 = vmatpush1.bf16.msra.mxu1 %v2140_v44  ;;  %v276_v44 = vld [vmem:[#allocation4 + $0x5b0] sm:$0xff] }
  0xeb   :  { %2525 = vmatpush1.bf16.msra.mxu0 %v2524_v45  ;;  %2143 = vmatprep.subr.bf16.mxu1 %v2142_v46  ;;  %v658_v45 = vld [vmem:[#allocation4 + $0x11a0] sm:$0xff]  ;;  %v2546_v46 = vpack.c.bf16 %v661_v39, %v659_v38  ;;  %v2164_v52 = vpack.c.bf16 %v276_v44, %v274_v43  ;;  %v76_v38 = vld [vmem:[#allocation2 + $0x38] sm:$0xff] }
  0xec   :  { %2527 = vmatprep.subr.bf16.mxu0 %v2526_v50  ;;  %v663_v50 = vld [vmem:[#allocation4 + $0x11c8] sm:$0xff]  ;;  %v2548_v53 = vpack.c.bf16 %v660_v47, %v658_v45  ;;  %v294_v43 = vld [vmem:[#allocation4 + $0x640] sm:$0xff]  ;;  %v296_v44 = vld [vmem:[#allocation4 + $0x650] sm:$0xff] }
  0xed   :  { %v678_v45 = vld [vmem:[#allocation4 + $0x1240] sm:$0xff]  ;;  %v680_v47 = vld [vmem:[#allocation4 + $0x1250] sm:$0xff] }
  0xee   :  { %2145 = vmatpush1.bf16.msra.mxu1 %v2144_v56  ;;  %v280_v56 = vld [vmem:[#allocation4 + $0x5d0] sm:$0xff] }
  0xef   :  { %2529 = vmatpush1.bf16.msra.mxu0 %v2528_v57  ;;  %2147 = vmatprep.subr.bf16.mxu1 %v2146_v58  ;;  %v662_v57 = vld [vmem:[#allocation4 + $0x11c0] sm:$0xff]  ;;  %v2550_v58 = vpack.c.bf16 %v665_v51, %v663_v50  ;;  %v2168_v0 = vpack.c.bf16 %v280_v56, %v278_v55  ;;  %v683_v50 = vld [vmem:[#allocation4 + $0x1268] sm:$0xff]  ;;  %v685_v51 = vld [vmem:[#allocation4 + $0x1278] sm:$0xff] }
  0xf0   :  { %2531 = vmatprep.subr.bf16.mxu0 %v2530_v62  ;;  %v667_v62 = vld [vmem:[#allocation4 + $0x11e8] sm:$0xff]  ;;  %v2552_v1 = vpack.c.bf16 %v664_v59, %v662_v57  ;;  %v298_v55 = vld [vmem:[#allocation4 + $0x660] sm:$0xff]  ;;  %v300_v56 = vld [vmem:[#allocation4 + $0x670] sm:$0xff] }
  0xf1   :  { %v682_v57 = vld [vmem:[#allocation4 + $0x1260] sm:$0xff]  ;;  %v684_v59 = vld [vmem:[#allocation4 + $0x1270] sm:$0xff] }
  0xf2   :  { %2149 = vmatpush1.bf16.msra.mxu1 %v2148_v4  ;;  %v284_v4 = vld [vmem:[#allocation4 + $0x5f0] sm:$0xff] }
  0xf3   :  { %2533 = vmatpush1.bf16.msra.mxu0 %v2532_v5  ;;  %2151 = vmatprep.subr.bf16.mxu1 %v2150_v6  ;;  %v666_v5 = vld [vmem:[#allocation4 + $0x11e0] sm:$0xff]  ;;  %v2554_v6 = vpack.c.bf16 %v669_v63, %v667_v62  ;;  %v2172_v12 = vpack.c.bf16 %v284_v4, %v282_v3  ;;  %v687_v62 = vld [vmem:[#allocation4 + $0x1288] sm:$0xff]  ;;  %v689_v63 = vld [vmem:[#allocation4 + $0x1298] sm:$0xff] }
  0xf4   :  { %2535 = vmatprep.subr.bf16.mxu0 %v2534_v10  ;;  %v671_v10 = vld [vmem:[#allocation4 + $0x1208] sm:$0xff]  ;;  %v2556_v13 = vpack.c.bf16 %v668_v7, %v666_v5  ;;  %v302_v3 = vld [vmem:[#allocation4 + $0x680] sm:$0xff]  ;;  %v304_v4 = vld [vmem:[#allocation4 + $0x690] sm:$0xff] }
  0xf5   :  { %v686_v5 = vld [vmem:[#allocation4 + $0x1280] sm:$0xff]  ;;  %v688_v7 = vld [vmem:[#allocation4 + $0x1290] sm:$0xff] }
  0xf6   :  { %2153 = vmatpush1.bf16.msra.mxu1 %v2152_v16  ;;  %v288_v16 = vld [vmem:[#allocation4 + $0x610] sm:$0xff] }
  0xf7   :  { %2537 = vmatpush1.bf16.msra.mxu0 %v2536_v17  ;;  %2155 = vmatprep.subr.bf16.mxu1 %v2154_v18  ;;  %v670_v17 = vld [vmem:[#allocation4 + $0x1200] sm:$0xff]  ;;  %v2558_v18 = vpack.c.bf16 %v673_v11, %v671_v10  ;;  %v2176_v25 = vpack.c.bf16 %v288_v16, %v286_v15  ;;  %v691_v10 = vld [vmem:[#allocation4 + $0x12a8] sm:$0xff]  ;;  %v693_v11 = vld [vmem:[#allocation4 + $0x12b8] sm:$0xff] }
  0xf8   :  { %2539 = vmatprep.subr.bf16.mxu0 %v2538_v22  ;;  %v675_v22 = vld [vmem:[#allocation4 + $0x1228] sm:$0xff]  ;;  %v2560_v27 = vpack.c.bf16 %v672_v19, %v670_v17  ;;  %v306_v15 = vld [vmem:[#allocation4 + $0x6a0] sm:$0xff]  ;;  %v308_v16 = vld [vmem:[#allocation4 + $0x6b0] sm:$0xff] }
  0xf9   :  { %v2562_v32 = vpack.c.bf16 %v677_v23, %v675_v22  ;;  %v690_v17 = vld [vmem:[#allocation4 + $0x12a0] sm:$0xff]  ;;  %v692_v19 = vld [vmem:[#allocation4 + $0x12b0] sm:$0xff]  ;;  %v695_v22 = vld [vmem:[#allocation4 + $0x12c8] sm:$0xff] }
  0xfa   :  { %2157 = vmatpush1.bf16.msra.mxu1 %v2156_v28  ;;  %v2178_v28 = vpack.c.bf16 %v293_v21, %v291_v20  ;;  %v311_v20 = vld [vmem:[#allocation4 + $0x6c8] sm:$0xff]  ;;  %v313_v21 = vld [vmem:[#allocation4 + $0x6d8] sm:$0xff] }
  0xfb   :  { %2541 = vmatpush1.bf16.msra.mxu0 %v2540_v29  ;;  %2159 = vmatprep.subr.bf16.mxu1 %v2158_v30  ;;  %v290_v29 = vld [vmem:[#allocation4 + $0x620] sm:$0xff]  ;;  %v292_v30 = vld [vmem:[#allocation4 + $0x630] sm:$0xff]  ;;  %v697_v23 = vld [vmem:[#allocation4 + $0x12d8] sm:$0xff] }
  0xfc   :  { %2543 = vmatprep.subr.bf16.mxu0 %v2542_v34  ;;  %v295_v34 = vld [vmem:[#allocation4 + $0x648] sm:$0xff]  ;;  %v2180_v39 = vpack.c.bf16 %v292_v30, %v290_v29  ;;  %v694_v29 = vld [vmem:[#allocation4 + $0x12c0] sm:$0xff]  ;;  %v2582_v30 = vpack.c.bf16 %v697_v23, %v695_v22 }
  0xfd   :  { %v330_v23 = vld [vmem:[#allocation4 + $0x760] sm:$0xff] }
  0xfe   :  { %2161 = vmatpush1.bf16.msra.mxu1 %v2160_v40  ;;  %v88_v40 = vld [vmem:[#allocation2 + $0x98] sm:$0xff] }
  0xff   :  { %2545 = vmatpush1.bf16.msra.mxu0 %v2544_v41  ;;  %2163 = vmatprep.subr.bf16.mxu1 %v2162_v42  ;;  %v2564_v41 = vpack.c.bf16 %v676_v33, %v674_v31  ;;  %v2182_v42 = vpack.c.bf16 %v297_v35, %v295_v34  ;;  %v696_v31 = vld [vmem:[#allocation4 + $0x12d0] sm:$0xff]  ;;  %v317_v33 = vld [vmem:[#allocation4 + $0x6f8] sm:$0xff]  ;;  %v699_v34 = vld [vmem:[#allocation4 + $0x12e8] sm:$0xff] }
 0x100   :  { %2547 = vmatprep.subr.bf16.mxu0 %v2546_v46  ;;  %v2566_v46 = vpack.c.bf16 %v681_v37, %v679_v36  ;;  %v701_v35 = vld [vmem:[#allocation4 + $0x12f8] sm:$0xff]  ;;  %v2584_v37 = vpack.c.bf16 %v696_v31, %v694_v29 }
 0x101   :  { %v337_v29 = vld [vmem:[#allocation4 + $0x798] sm:$0xff] }
 0x102   :  { %2165 = vmatpush1.bf16.msra.mxu1 %v2164_v52  ;;  %v2184_v52 = vpack.c.bf16 %v296_v44, %v294_v43  ;;  %v700_v43 = vld [vmem:[#allocation4 + $0x12f0] sm:$0xff]  ;;  %v319_v44 = vld [vmem:[#allocation4 + $0x708] sm:$0xff]  ;;  %v721_v31 = vld [vmem:[#allocation4 + $0x1398] sm:$0xff] }
 0x103   :  { %2549 = vmatpush1.bf16.msra.mxu0 %v2548_v53  ;;  %2167 = vmatprep.subr.bf16.mxu1 %v2166_v54  ;;  %v2568_v53 = vpack.c.bf16 %v680_v47, %v678_v45  ;;  %v2186_v54 = vpack.c.bf16 %v301_v49, %v299_v48  ;;  %v321_v45 = vld [vmem:[#allocation4 + $0x718] sm:$0xff] }
 0x104   :  { %2551 = vmatprep.subr.bf16.mxu0 %v2550_v58  ;;  %v2570_v58 = vpack.c.bf16 %v685_v51, %v683_v50  ;;  %v705_v47 = vld [vmem:[#allocation4 + $0x1318] sm:$0xff]  ;;  %v2206_v50 = vpack.c.bf16 %v321_v45, %v319_v44  ;;  %v318_v51 = vld [vmem:[#allocation4 + $0x700] sm:$0xff] }
 0x106   :  { %2169 = vmatpush1.bf16.msra.mxu1 %v2168_v0  ;;  %v2188_v0 = vpack.c.bf16 %v300_v56, %v298_v55  ;;  %v704_v55 = vld [vmem:[#allocation4 + $0x1310] sm:$0xff]  ;;  %v323_v56 = vld [vmem:[#allocation4 + $0x728] sm:$0xff] }
 0x107   :  { %2553 = vmatpush1.bf16.msra.mxu0 %v2552_v1  ;;  %2171 = vmatprep.subr.bf16.mxu1 %v2170_v2  ;;  %v2572_v1 = vpack.c.bf16 %v684_v59, %v682_v57  ;;  %v2190_v2 = vpack.c.bf16 %v305_v61, %v303_v60  ;;  %v325_v57 = vld [vmem:[#allocation4 + $0x738] sm:$0xff] }
 0x108   :  { %2555 = vmatprep.subr.bf16.mxu0 %v2554_v6  ;;  %v2574_v6 = vpack.c.bf16 %v689_v63, %v687_v62  ;;  %v709_v59 = vld [vmem:[#allocation4 + $0x1338] sm:$0xff]  ;;  %v2210_v62 = vpack.c.bf16 %v325_v57, %v323_v56  ;;  %v322_v63 = vld [vmem:[#allocation4 + $0x720] sm:$0xff] }
 0x10a   :  { %2173 = vmatpush1.bf16.msra.mxu1 %v2172_v12  ;;  %v2192_v12 = vpack.c.bf16 %v304_v4, %v302_v3  ;;  %v708_v3 = vld [vmem:[#allocation4 + $0x1330] sm:$0xff]  ;;  %v327_v4 = vld [vmem:[#allocation4 + $0x748] sm:$0xff] }
 0x10b   :  { %2557 = vmatpush1.bf16.msra.mxu0 %v2556_v13  ;;  %2175 = vmatprep.subr.bf16.mxu1 %v2174_v14  ;;  %v2576_v13 = vpack.c.bf16 %v688_v7, %v686_v5  ;;  %v2194_v14 = vpack.c.bf16 %v309_v9, %v307_v8  ;;  %v329_v5 = vld [vmem:[#allocation4 + $0x758] sm:$0xff] }
 0x10c   :  { %2559 = vmatprep.subr.bf16.mxu0 %v2558_v18  ;;  %v2578_v18 = vpack.c.bf16 %v693_v11, %v691_v10  ;;  %v713_v7 = vld [vmem:[#allocation4 + $0x1358] sm:$0xff]  ;;  %v2214_v10 = vpack.c.bf16 %v329_v5, %v327_v4  ;;  %v326_v11 = vld [vmem:[#allocation4 + $0x740] sm:$0xff] }
 0x10d   :  { %1100 = vmatmul.mubr.f32.vlgmr.msra.gmra.mrb[0].mxu1 %v73_v24  ;;  %v2196_v24 = vpack.c.bf16 %v308_v16, %v306_v15  ;;  %v712_v15 = vld [vmem:[#allocation4 + $0x1350] sm:$0xff]  ;;  %v331_v16 = vld [vmem:[#allocation4 + $0x768] sm:$0xff] }
 0x10e   :  { %2177 = vmatpush1.bf16.msra.mxu1 %v2176_v25  ;;  %1526 = vmatmul.mubr.f32.vlgmr.msra.gmra.mrb[0].mxu0 %v85_v26  ;;  %v2580_v25 = vpack.c.bf16 %v692_v19, %v690_v17  ;;  %v2198_v26 = vpack.c.bf16 %v313_v21, %v311_v20  ;;  %v333_v17 = vld [vmem:[#allocation4 + $0x778] sm:$0xff] }
 0x10f   :  { %2561 = vmatpush1.bf16.msra.mxu0 %v2560_v27  ;;  %2179 = vmatprep.subr.bf16.mxu1 %v2178_v28  ;;  %v310_v27 = vld [vmem:[#allocation4 + $0x6c0] sm:$0xff]  ;;  %v312_v28 = vld [vmem:[#allocation4 + $0x6d0] sm:$0xff]  ;;  %v717_v19 = vld [vmem:[#allocation4 + $0x1378] sm:$0xff]  ;;  %v2218_v22 = vpack.c.bf16 %v333_v17, %v331_v16 }
 0x110   :  { %2563 = vmatprep.subr.bf16.mxu0 %v2562_v32  ;;  %1170 = vmatprep.mubr.f32.mxu1 %v76_v38  ;;  %v315_v32 = vld [vmem:[#allocation4 + $0x6e8] sm:$0xff]  ;;  %v2200_v36 = vpack.c.bf16 %v312_v28, %v310_v27  ;;  %v716_v27 = vld [vmem:[#allocation4 + $0x1370] sm:$0xff] }
 0x111   :  { %1596 = vmatprep.mubr.f32.mxu0 %v88_v40  ;;  %v2202_v38 = vpack.c.bf16 %v317_v33, %v315_v32  ;;  %v316_v40 = vld [vmem:[#allocation4 + $0x6f0] sm:$0xff]  ;;  %v335_v28 = vld [vmem:[#allocation4 + $0x788] sm:$0xff] }
 0x112   :  { %2181 = vmatpush1.bf16.msra.mxu1 %v2180_v39  ;;  %v314_v39 = vld [vmem:[#allocation4 + $0x6e0] sm:$0xff] }
 0x113   :  { %2565 = vmatpush1.bf16.msra.mxu0 %v2564_v41  ;;  %2183 = vmatprep.subr.bf16.mxu1 %v2182_v42  ;;  %v698_v41 = vld [vmem:[#allocation4 + $0x12e0] sm:$0xff]  ;;  %v2586_v42 = vpack.c.bf16 %v701_v35, %v699_v34  ;;  %v2204_v48 = vpack.c.bf16 %v316_v40, %v314_v39  ;;  %v2222_v34 = vpack.c.bf16 %v337_v29, %v335_v28  ;;  %v720_v39 = vld [vmem:[#allocation4 + $0x1390] sm:$0xff]  ;;  %v339_v40 = vld [vmem:[#allocation4 + $0x7a8] sm:$0xff] }
 0x114   :  { %2567 = vmatprep.subr.bf16.mxu0 %v2566_v46  ;;  %v703_v46 = vld [vmem:[#allocation4 + $0x1308] sm:$0xff]  ;;  %v2588_v49 = vpack.c.bf16 %v700_v43, %v698_v41  ;;  %v334_v35 = vld [vmem:[#allocation4 + $0x780] sm:$0xff]  ;;  %v341_v41 = vld [vmem:[#allocation4 + $0x7b8] sm:$0xff] }
 0x115   :  { %v725_v43 = vld [vmem:[#allocation4 + $0x13b8] sm:$0xff]  ;;  %v75_v28 = vld [vmem:[#allocation2 + $0x30] sm:$0xff] }
 0x116   :  { %2185 = vmatpush1.bf16.msra.mxu1 %v2184_v52  ;;  %v320_v52 = vld [vmem:[#allocation4 + $0x710] sm:$0xff] }
 0x117   :  { %2569 = vmatpush1.bf16.msra.mxu0 %v2568_v53  ;;  %2187 = vmatprep.subr.bf16.mxu1 %v2186_v54  ;;  %v702_v53 = vld [vmem:[#allocation4 + $0x1300] sm:$0xff]  ;;  %v2590_v54 = vpack.c.bf16 %v705_v47, %v703_v46  ;;  %v2208_v60 = vpack.c.bf16 %v320_v52, %v318_v51  ;;  %v2226_v46 = vpack.c.bf16 %v341_v41, %v339_v40  ;;  %v724_v51 = vld [vmem:[#allocation4 + $0x13b0] sm:$0xff]  ;;  %v343_v52 = vld [vmem:[#allocation4 + $0x7c8] sm:$0xff] }
 0x118   :  { %2571 = vmatprep.subr.bf16.mxu0 %v2570_v58  ;;  %v707_v58 = vld [vmem:[#allocation4 + $0x1328] sm:$0xff]  ;;  %v2592_v61 = vpack.c.bf16 %v704_v55, %v702_v53  ;;  %v338_v47 = vld [vmem:[#allocation4 + $0x7a0] sm:$0xff]  ;;  %v345_v53 = vld [vmem:[#allocation4 + $0x7d8] sm:$0xff] }
 0x119   :  { %v729_v55 = vld [vmem:[#allocation4 + $0x13d8] sm:$0xff]  ;;  %v743_v40 = vld [vmem:[#allocation4 + $0x1448] sm:$0xff] }
 0x11a   :  { %2189 = vmatpush1.bf16.msra.mxu1 %v2188_v0  ;;  %v324_v0 = vld [vmem:[#allocation4 + $0x730] sm:$0xff]  ;;  %v745_v41 = vld [vmem:[#allocation4 + $0x1458] sm:$0xff] }
 0x11b   :  { %2573 = vmatpush1.bf16.msra.mxu0 %v2572_v1  ;;  %2191 = vmatprep.subr.bf16.mxu1 %v2190_v2  ;;  %v706_v1 = vld [vmem:[#allocation4 + $0x1320] sm:$0xff]  ;;  %v2594_v2 = vpack.c.bf16 %v709_v59, %v707_v58  ;;  %v2212_v8 = vpack.c.bf16 %v324_v0, %v322_v63  ;;  %v2230_v58 = vpack.c.bf16 %v345_v53, %v343_v52  ;;  %v728_v63 = vld [vmem:[#allocation4 + $0x13d0] sm:$0xff]  ;;  %v347_v0 = vld [vmem:[#allocation4 + $0x7e8] sm:$0xff] }
 0x11c   :  { %2575 = vmatprep.subr.bf16.mxu0 %v2574_v6  ;;  %v711_v6 = vld [vmem:[#allocation4 + $0x1348] sm:$0xff]  ;;  %v2596_v9 = vpack.c.bf16 %v708_v3, %v706_v1  ;;  %v342_v59 = vld [vmem:[#allocation4 + $0x7c0] sm:$0xff]  ;;  %v349_v1 = vld [vmem:[#allocation4 + $0x7f8] sm:$0xff] }
 0x11d   :  { %v733_v3 = vld [vmem:[#allocation4 + $0x13f8] sm:$0xff]  ;;  %v363_v52 = vld [vmem:[#allocation4 + $0x868] sm:$0xff] }
 0x11e   :  { %2193 = vmatpush1.bf16.msra.mxu1 %v2192_v12  ;;  %v328_v12 = vld [vmem:[#allocation4 + $0x750] sm:$0xff]  ;;  %v365_v53 = vld [vmem:[#allocation4 + $0x878] sm:$0xff] }
 0x11f   :  { %2577 = vmatpush1.bf16.msra.mxu0 %v2576_v13  ;;  %2195 = vmatprep.subr.bf16.mxu1 %v2194_v14  ;;  %v710_v13 = vld [vmem:[#allocation4 + $0x1340] sm:$0xff]  ;;  %v2598_v14 = vpack.c.bf16 %v713_v7, %v711_v6  ;;  %v2216_v20 = vpack.c.bf16 %v328_v12, %v326_v11  ;;  %v2234_v6 = vpack.c.bf16 %v349_v1, %v347_v0  ;;  %v732_v11 = vld [vmem:[#allocation4 + $0x13f0] sm:$0xff]  ;;  %v351_v12 = vld [vmem:[#allocation4 + $0x808] sm:$0xff] }
 0x120   :  { %2579 = vmatprep.subr.bf16.mxu0 %v2578_v18  ;;  %v715_v18 = vld [vmem:[#allocation4 + $0x1368] sm:$0xff]  ;;  %v2600_v21 = vpack.c.bf16 %v712_v15, %v710_v13  ;;  %v346_v7 = vld [vmem:[#allocation4 + $0x7e0] sm:$0xff]  ;;  %v353_v13 = vld [vmem:[#allocation4 + $0x818] sm:$0xff] }
 0x121   :  { %v737_v15 = vld [vmem:[#allocation4 + $0x1418] sm:$0xff]  ;;  %v367_v0 = vld [vmem:[#allocation4 + $0x888] sm:$0xff] }
 0x122   :  { %2197 = vmatpush1.bf16.msra.mxu1 %v2196_v24  ;;  %v332_v24 = vld [vmem:[#allocation4 + $0x770] sm:$0xff]  ;;  %v369_v1 = vld [vmem:[#allocation4 + $0x898] sm:$0xff] }
 0x123   :  { %2581 = vmatpush1.bf16.msra.mxu0 %v2580_v25  ;;  %2199 = vmatprep.subr.bf16.mxu1 %v2198_v26  ;;  %v714_v25 = vld [vmem:[#allocation4 + $0x1360] sm:$0xff]  ;;  %v2602_v26 = vpack.c.bf16 %v717_v19, %v715_v18  ;;  %v2220_v32 = vpack.c.bf16 %v332_v24, %v330_v23  ;;  %v2238_v18 = vpack.c.bf16 %v353_v13, %v351_v12  ;;  %v736_v23 = vld [vmem:[#allocation4 + $0x1410] sm:$0xff]  ;;  %v355_v24 = vld [vmem:[#allocation4 + $0x828] sm:$0xff] }
 0x124   :  { %2583 = vmatprep.subr.bf16.mxu0 %v2582_v30  ;;  %v719_v30 = vld [vmem:[#allocation4 + $0x1388] sm:$0xff]  ;;  %v2604_v33 = vpack.c.bf16 %v716_v27, %v714_v25  ;;  %v350_v19 = vld [vmem:[#allocation4 + $0x800] sm:$0xff]  ;;  %v357_v25 = vld [vmem:[#allocation4 + $0x838] sm:$0xff] }
 0x125   :  { %v741_v27 = vld [vmem:[#allocation4 + $0x1438] sm:$0xff]  ;;  %v371_v12 = vld [vmem:[#allocation4 + $0x8a8] sm:$0xff] }
 0x126   :  { %2201 = vmatpush1.bf16.msra.mxu1 %v2200_v36  ;;  %v336_v36 = vld [vmem:[#allocation4 + $0x790] sm:$0xff]  ;;  %v373_v13 = vld [vmem:[#allocation4 + $0x8b8] sm:$0xff] }
 0x127   :  { %2585 = vmatpush1.bf16.msra.mxu0 %v2584_v37  ;;  %2203 = vmatprep.subr.bf16.mxu1 %v2202_v38  ;;  %v718_v37 = vld [vmem:[#allocation4 + $0x1380] sm:$0xff]  ;;  %v2606_v38 = vpack.c.bf16 %v721_v31, %v719_v30  ;;  %v2224_v44 = vpack.c.bf16 %v336_v36, %v334_v35  ;;  %v87_v30 = vld [vmem:[#allocation2 + $0x90] sm:$0xff] }
 0x128   :  { %2587 = vmatprep.subr.bf16.mxu0 %v2586_v42  ;;  %v723_v42 = vld [vmem:[#allocation4 + $0x13a8] sm:$0xff]  ;;  %v2608_v45 = vpack.c.bf16 %v720_v39, %v718_v37  ;;  %v738_v35 = vld [vmem:[#allocation4 + $0x1420] sm:$0xff]  ;;  %v740_v37 = vld [vmem:[#allocation4 + $0x1430] sm:$0xff] }
 0x129   :  { %v361_v39 = vld [vmem:[#allocation4 + $0x858] sm:$0xff] }
 0x12a   :  { %2205 = vmatpush1.bf16.msra.mxu1 %v2204_v48  ;;  %v340_v48 = vld [vmem:[#allocation4 + $0x7b0] sm:$0xff] }
 0x12b   :  { %2589 = vmatpush1.bf16.msra.mxu0 %v2588_v49  ;;  %2207 = vmatprep.subr.bf16.mxu1 %v2206_v50  ;;  %v722_v49 = vld [vmem:[#allocation4 + $0x13a0] sm:$0xff]  ;;  %v2610_v50 = vpack.c.bf16 %v725_v43, %v723_v42  ;;  %v2228_v56 = vpack.c.bf16 %v340_v48, %v338_v47  ;;  %v360_v48 = vld [vmem:[#allocation4 + $0x850] sm:$0xff] }
 0x12c   :  { %2591 = vmatprep.subr.bf16.mxu0 %v2590_v54  ;;  %v727_v54 = vld [vmem:[#allocation4 + $0x13c8] sm:$0xff]  ;;  %v2612_v57 = vpack.c.bf16 %v724_v51, %v722_v49  ;;  %v78_v42 = vld [vmem:[#allocation2 + $0x48] sm:$0xff]  ;;  %v744_v51 = vld [vmem:[#allocation4 + $0x1450] sm:$0xff] }
 0x12d   :  { %v358_v47 = vld [vmem:[#allocation4 + $0x840] sm:$0xff] }
 0x12e   :  { %2209 = vmatpush1.bf16.msra.mxu1 %v2208_v60  ;;  %v344_v60 = vld [vmem:[#allocation4 + $0x7d0] sm:$0xff]  ;;  %v742_v49 = vld [vmem:[#allocation4 + $0x1440] sm:$0xff] }
 0x12f   :  { %2593 = vmatpush1.bf16.msra.mxu0 %v2592_v61  ;;  %2211 = vmatprep.subr.bf16.mxu1 %v2210_v62  ;;  %v726_v61 = vld [vmem:[#allocation4 + $0x13c0] sm:$0xff]  ;;  %v2614_v62 = vpack.c.bf16 %v729_v55, %v727_v54  ;;  %v2232_v4 = vpack.c.bf16 %v344_v60, %v342_v59  ;;  %v747_v54 = vld [vmem:[#allocation4 + $0x1468] sm:$0xff]  ;;  %v749_v55 = vld [vmem:[#allocation4 + $0x1478] sm:$0xff] }
 0x130   :  { %2595 = vmatprep.subr.bf16.mxu0 %v2594_v2  ;;  %v731_v2 = vld [vmem:[#allocation4 + $0x13e8] sm:$0xff]  ;;  %v2616_v5 = vpack.c.bf16 %v728_v63, %v726_v61  ;;  %v362_v59 = vld [vmem:[#allocation4 + $0x860] sm:$0xff]  ;;  %v364_v60 = vld [vmem:[#allocation4 + $0x870] sm:$0xff] }
 0x131   :  { %v746_v61 = vld [vmem:[#allocation4 + $0x1460] sm:$0xff]  ;;  %v748_v63 = vld [vmem:[#allocation4 + $0x1470] sm:$0xff] }
 0x132   :  { %2213 = vmatpush1.bf16.msra.mxu1 %v2212_v8  ;;  %v348_v8 = vld [vmem:[#allocation4 + $0x7f0] sm:$0xff] }
 0x133   :  { %2597 = vmatpush1.bf16.msra.mxu0 %v2596_v9  ;;  %2215 = vmatprep.subr.bf16.mxu1 %v2214_v10  ;;  %v730_v9 = vld [vmem:[#allocation4 + $0x13e0] sm:$0xff]  ;;  %v2618_v10 = vpack.c.bf16 %v733_v3, %v731_v2  ;;  %v2236_v16 = vpack.c.bf16 %v348_v8, %v346_v7  ;;  %v751_v2 = vld [vmem:[#allocation4 + $0x1488] sm:$0xff]  ;;  %v753_v3 = vld [vmem:[#allocation4 + $0x1498] sm:$0xff] }
 0x134   :  { %2599 = vmatprep.subr.bf16.mxu0 %v2598_v14  ;;  %v735_v14 = vld [vmem:[#allocation4 + $0x1408] sm:$0xff]  ;;  %v2620_v17 = vpack.c.bf16 %v732_v11, %v730_v9  ;;  %v366_v7 = vld [vmem:[#allocation4 + $0x880] sm:$0xff]  ;;  %v368_v8 = vld [vmem:[#allocation4 + $0x890] sm:$0xff] }
 0x135   :  { %v750_v9 = vld [vmem:[#allocation4 + $0x1480] sm:$0xff]  ;;  %v752_v11 = vld [vmem:[#allocation4 + $0x1490] sm:$0xff] }
 0x136   :  { %2217 = vmatpush1.bf16.msra.mxu1 %v2216_v20  ;;  %v352_v20 = vld [vmem:[#allocation4 + $0x810] sm:$0xff] }
 0x137   :  { %2601 = vmatpush1.bf16.msra.mxu0 %v2600_v21  ;;  %2219 = vmatprep.subr.bf16.mxu1 %v2218_v22  ;;  %v734_v21 = vld [vmem:[#allocation4 + $0x1400] sm:$0xff]  ;;  %v2622_v22 = vpack.c.bf16 %v737_v15, %v735_v14  ;;  %v2240_v29 = vpack.c.bf16 %v352_v20, %v350_v19  ;;  %v755_v14 = vld [vmem:[#allocation4 + $0x14a8] sm:$0xff]  ;;  %v757_v15 = vld [vmem:[#allocation4 + $0x14b8] sm:$0xff] }
 0x138   :  { %2603 = vmatprep.subr.bf16.mxu0 %v2602_v26  ;;  %v739_v26 = vld [vmem:[#allocation4 + $0x1428] sm:$0xff]  ;;  %v2624_v31 = vpack.c.bf16 %v736_v23, %v734_v21  ;;  %v370_v19 = vld [vmem:[#allocation4 + $0x8a0] sm:$0xff]  ;;  %v372_v20 = vld [vmem:[#allocation4 + $0x8b0] sm:$0xff] }
 0x139   :  { %v2626_v36 = vpack.c.bf16 %v741_v27, %v739_v26  ;;  %v754_v21 = vld [vmem:[#allocation4 + $0x14a0] sm:$0xff]  ;;  %v756_v23 = vld [vmem:[#allocation4 + $0x14b0] sm:$0xff]  ;;  %v759_v26 = vld [vmem:[#allocation4 + $0x14c8] sm:$0xff] }
 0x13a   :  { %2221 = vmatpush1.bf16.msra.mxu1 %v2220_v32  ;;  %v2242_v32 = vpack.c.bf16 %v357_v25, %v355_v24  ;;  %v375_v24 = vld [vmem:[#allocation4 + $0x8c8] sm:$0xff]  ;;  %v377_v25 = vld [vmem:[#allocation4 + $0x8d8] sm:$0xff] }
 0x13b   :  { %2605 = vmatpush1.bf16.msra.mxu0 %v2604_v33  ;;  %2223 = vmatprep.subr.bf16.mxu1 %v2222_v34  ;;  %v354_v33 = vld [vmem:[#allocation4 + $0x820] sm:$0xff]  ;;  %v356_v34 = vld [vmem:[#allocation4 + $0x830] sm:$0xff]  ;;  %v761_v27 = vld [vmem:[#allocation4 + $0x14d8] sm:$0xff] }
 0x13c   :  { %2607 = vmatprep.subr.bf16.mxu0 %v2606_v38  ;;  %v359_v38 = vld [vmem:[#allocation4 + $0x848] sm:$0xff]  ;;  %v2244_v43 = vpack.c.bf16 %v356_v34, %v354_v33  ;;  %v758_v33 = vld [vmem:[#allocation4 + $0x14c0] sm:$0xff]  ;;  %v2646_v34 = vpack.c.bf16 %v761_v27, %v759_v26 }
 0x13d   :  { %v394_v27 = vld [vmem:[#allocation4 + $0x960] sm:$0xff] }
 0x13e   :  { %2225 = vmatpush1.bf16.msra.mxu1 %v2224_v44  ;;  %v90_v44 = vld [vmem:[#allocation2 + $0xa8] sm:$0xff] }
 0x13f   :  { %2609 = vmatpush1.bf16.msra.mxu0 %v2608_v45  ;;  %2227 = vmatprep.subr.bf16.mxu1 %v2226_v46  ;;  %v2628_v45 = vpack.c.bf16 %v740_v37, %v738_v35  ;;  %v2246_v46 = vpack.c.bf16 %v361_v39, %v359_v38  ;;  %v760_v35 = vld [vmem:[#allocation4 + $0x14d0] sm:$0xff]  ;;  %v381_v37 = vld [vmem:[#allocation4 + $0x8f8] sm:$0xff]  ;;  %v763_v38 = vld [vmem:[#allocation4 + $0x14e8] sm:$0xff] }
 0x140   :  { %2611 = vmatprep.subr.bf16.mxu0 %v2610_v50  ;;  %v2630_v50 = vpack.c.bf16 %v745_v41, %v743_v40  ;;  %v765_v39 = vld [vmem:[#allocation4 + $0x14f8] sm:$0xff]  ;;  %v2648_v41 = vpack.c.bf16 %v760_v35, %v758_v33 }
 0x141   :  { %v401_v33 = vld [vmem:[#allocation4 + $0x998] sm:$0xff] }
 0x142   :  { %2229 = vmatpush1.bf16.msra.mxu1 %v2228_v56  ;;  %v2248_v56 = vpack.c.bf16 %v360_v48, %v358_v47  ;;  %v764_v47 = vld [vmem:[#allocation4 + $0x14f0] sm:$0xff]  ;;  %v383_v48 = vld [vmem:[#allocation4 + $0x908] sm:$0xff]  ;;  %v785_v35 = vld [vmem:[#allocation4 + $0x1598] sm:$0xff] }
 0x143   :  { %2613 = vmatpush1.bf16.msra.mxu0 %v2612_v57  ;;  %2231 = vmatprep.subr.bf16.mxu1 %v2230_v58  ;;  %v2632_v57 = vpack.c.bf16 %v744_v51, %v742_v49  ;;  %v2250_v58 = vpack.c.bf16 %v365_v53, %v363_v52  ;;  %v385_v49 = vld [vmem:[#allocation4 + $0x918] sm:$0xff] }
 0x144   :  { %2615 = vmatprep.subr.bf16.mxu0 %v2614_v62  ;;  %v2634_v62 = vpack.c.bf16 %v749_v55, %v747_v54  ;;  %v769_v51 = vld [vmem:[#allocation4 + $0x1518] sm:$0xff]  ;;  %v2270_v54 = vpack.c.bf16 %v385_v49, %v383_v48  ;;  %v382_v55 = vld [vmem:[#allocation4 + $0x900] sm:$0xff] }
 0x146   :  { %2233 = vmatpush1.bf16.msra.mxu1 %v2232_v4  ;;  %v2252_v4 = vpack.c.bf16 %v364_v60, %v362_v59  ;;  %v768_v59 = vld [vmem:[#allocation4 + $0x1510] sm:$0xff]  ;;  %v387_v60 = vld [vmem:[#allocation4 + $0x928] sm:$0xff] }
 0x147   :  { %2617 = vmatpush1.bf16.msra.mxu0 %v2616_v5  ;;  %2235 = vmatprep.subr.bf16.mxu1 %v2234_v6  ;;  %v2636_v5 = vpack.c.bf16 %v748_v63, %v746_v61  ;;  %v2254_v6 = vpack.c.bf16 %v369_v1, %v367_v0  ;;  %v389_v61 = vld [vmem:[#allocation4 + $0x938] sm:$0xff] }
 0x148   :  { %2619 = vmatprep.subr.bf16.mxu0 %v2618_v10  ;;  %v2638_v10 = vpack.c.bf16 %v753_v3, %v751_v2  ;;  %v773_v63 = vld [vmem:[#allocation4 + $0x1538] sm:$0xff]  ;;  %v2274_v2 = vpack.c.bf16 %v389_v61, %v387_v60  ;;  %v386_v3 = vld [vmem:[#allocation4 + $0x920] sm:$0xff] }
 0x14a   :  { %2237 = vmatpush1.bf16.msra.mxu1 %v2236_v16  ;;  %v2256_v16 = vpack.c.bf16 %v368_v8, %v366_v7  ;;  %v772_v7 = vld [vmem:[#allocation4 + $0x1530] sm:$0xff]  ;;  %v391_v8 = vld [vmem:[#allocation4 + $0x948] sm:$0xff] }
 0x14b   :  { %2621 = vmatpush1.bf16.msra.mxu0 %v2620_v17  ;;  %2239 = vmatprep.subr.bf16.mxu1 %v2238_v18  ;;  %v2640_v17 = vpack.c.bf16 %v752_v11, %v750_v9  ;;  %v2258_v18 = vpack.c.bf16 %v373_v13, %v371_v12  ;;  %v393_v9 = vld [vmem:[#allocation4 + $0x958] sm:$0xff] }
 0x14c   :  { %2623 = vmatprep.subr.bf16.mxu0 %v2622_v22  ;;  %v2642_v22 = vpack.c.bf16 %v757_v15, %v755_v14  ;;  %v777_v11 = vld [vmem:[#allocation4 + $0x1558] sm:$0xff]  ;;  %v2278_v14 = vpack.c.bf16 %v393_v9, %v391_v8  ;;  %v390_v15 = vld [vmem:[#allocation4 + $0x940] sm:$0xff] }
 0x14d   :  { %1171 = vmatmul.mubr.f32.vlgmr.msra.gmra.mrb[0].mxu1 %v75_v28  ;;  %v2260_v28 = vpack.c.bf16 %v372_v20, %v370_v19  ;;  %v776_v19 = vld [vmem:[#allocation4 + $0x1550] sm:$0xff]  ;;  %v395_v20 = vld [vmem:[#allocation4 + $0x968] sm:$0xff] }
 0x14e   :  { %2241 = vmatpush1.bf16.msra.mxu1 %v2240_v29  ;;  %1597 = vmatmul.mubr.f32.vlgmr.msra.gmra.mrb[0].mxu0 %v87_v30  ;;  %v2644_v29 = vpack.c.bf16 %v756_v23, %v754_v21  ;;  %v2262_v30 = vpack.c.bf16 %v377_v25, %v375_v24  ;;  %v397_v21 = vld [vmem:[#allocation4 + $0x978] sm:$0xff] }
 0x14f   :  { %2625 = vmatpush1.bf16.msra.mxu0 %v2624_v31  ;;  %2243 = vmatprep.subr.bf16.mxu1 %v2242_v32  ;;  %v374_v31 = vld [vmem:[#allocation4 + $0x8c0] sm:$0xff]  ;;  %v376_v32 = vld [vmem:[#allocation4 + $0x8d0] sm:$0xff]  ;;  %v781_v23 = vld [vmem:[#allocation4 + $0x1578] sm:$0xff]  ;;  %v2282_v26 = vpack.c.bf16 %v397_v21, %v395_v20 }
 0x150   :  { %2627 = vmatprep.subr.bf16.mxu0 %v2626_v36  ;;  %1241 = vmatprep.mubr.f32.mxu1 %v78_v42  ;;  %v379_v36 = vld [vmem:[#allocation4 + $0x8e8] sm:$0xff]  ;;  %v2264_v40 = vpack.c.bf16 %v376_v32, %v374_v31  ;;  %v780_v31 = vld [vmem:[#allocation4 + $0x1570] sm:$0xff] }
 0x151   :  { %1667 = vmatprep.mubr.f32.mxu0 %v90_v44  ;;  %v2266_v42 = vpack.c.bf16 %v381_v37, %v379_v36  ;;  %v380_v44 = vld [vmem:[#allocation4 + $0x8f0] sm:$0xff]  ;;  %v399_v32 = vld [vmem:[#allocation4 + $0x988] sm:$0xff] }
 0x152   :  { %2245 = vmatpush1.bf16.msra.mxu1 %v2244_v43  ;;  %v378_v43 = vld [vmem:[#allocation4 + $0x8e0] sm:$0xff] }
 0x153   :  { %2629 = vmatpush1.bf16.msra.mxu0 %v2628_v45  ;;  %2247 = vmatprep.subr.bf16.mxu1 %v2246_v46  ;;  %v762_v45 = vld [vmem:[#allocation4 + $0x14e0] sm:$0xff]  ;;  %v2650_v46 = vpack.c.bf16 %v765_v39, %v763_v38  ;;  %v2268_v52 = vpack.c.bf16 %v380_v44, %v378_v43  ;;  %v2286_v38 = vpack.c.bf16 %v401_v33, %v399_v32  ;;  %v784_v43 = vld [vmem:[#allocation4 + $0x1590] sm:$0xff]  ;;  %v403_v44 = vld [vmem:[#allocation4 + $0x9a8] sm:$0xff] }
 0x154   :  { %2631 = vmatprep.subr.bf16.mxu0 %v2630_v50  ;;  %v767_v50 = vld [vmem:[#allocation4 + $0x1508] sm:$0xff]  ;;  %v2652_v53 = vpack.c.bf16 %v764_v47, %v762_v45  ;;  %v398_v39 = vld [vmem:[#allocation4 + $0x980] sm:$0xff]  ;;  %v405_v45 = vld [vmem:[#allocation4 + $0x9b8] sm:$0xff] }
 0x155   :  { %v789_v47 = vld [vmem:[#allocation4 + $0x15b8] sm:$0xff] }
 0x156   :  { %2249 = vmatpush1.bf16.msra.mxu1 %v2248_v56  ;;  %v384_v56 = vld [vmem:[#allocation4 + $0x910] sm:$0xff]  ;;  %v77_v32 = vld [vmem:[#allocation2 + $0x40] sm:$0xff] }
 0x157   :  { %2633 = vmatpush1.bf16.msra.mxu0 %v2632_v57  ;;  %2251 = vmatprep.subr.bf16.mxu1 %v2250_v58  ;;  %v766_v57 = vld [vmem:[#allocation4 + $0x1500] sm:$0xff]  ;;  %v2654_v58 = vpack.c.bf16 %v769_v51, %v767_v50  ;;  %v2272_v0 = vpack.c.bf16 %v384_v56, %v382_v55  ;;  %v2290_v50 = vpack.c.bf16 %v405_v45, %v403_v44  ;;  %v788_v55 = vld [vmem:[#allocation4 + $0x15b0] sm:$0xff]  ;;  %v407_v56 = vld [vmem:[#allocation4 + $0x9c8] sm:$0xff] }
 0x158   :  { %2635 = vmatprep.subr.bf16.mxu0 %v2634_v62  ;;  %v771_v62 = vld [vmem:[#allocation4 + $0x1528] sm:$0xff]  ;;  %v2656_v1 = vpack.c.bf16 %v768_v59, %v766_v57  ;;  %v402_v51 = vld [vmem:[#allocation4 + $0x9a0] sm:$0xff]  ;;  %v409_v57 = vld [vmem:[#allocation4 + $0x9d8] sm:$0xff] }
 0x159   :  { %v793_v59 = vld [vmem:[#allocation4 + $0x15d8] sm:$0xff]  ;;  %v807_v44 = vld [vmem:[#allocation4 + $0x1648] sm:$0xff] }
 0x15a   :  { %2253 = vmatpush1.bf16.msra.mxu1 %v2252_v4  ;;  %v388_v4 = vld [vmem:[#allocation4 + $0x930] sm:$0xff]  ;;  %v809_v45 = vld [vmem:[#allocation4 + $0x1658] sm:$0xff] }
 0x15b   :  { %2637 = vmatpush1.bf16.msra.mxu0 %v2636_v5  ;;  %2255 = vmatprep.subr.bf16.mxu1 %v2254_v6  ;;  %v770_v5 = vld [vmem:[#allocation4 + $0x1520] sm:$0xff]  ;;  %v2658_v6 = vpack.c.bf16 %v773_v63, %v771_v62  ;;  %v2276_v12 = vpack.c.bf16 %v388_v4, %v386_v3  ;;  %v2294_v62 = vpack.c.bf16 %v409_v57, %v407_v56  ;;  %v792_v3 = vld [vmem:[#allocation4 + $0x15d0] sm:$0xff]  ;;  %v411_v4 = vld [vmem:[#allocation4 + $0x9e8] sm:$0xff] }
 0x15c   :  { %2639 = vmatprep.subr.bf16.mxu0 %v2638_v10  ;;  %v775_v10 = vld [vmem:[#allocation4 + $0x1548] sm:$0xff]  ;;  %v2660_v13 = vpack.c.bf16 %v772_v7, %v770_v5  ;;  %v406_v63 = vld [vmem:[#allocation4 + $0x9c0] sm:$0xff]  ;;  %v413_v5 = vld [vmem:[#allocation4 + $0x9f8] sm:$0xff] }
 0x15d   :  { %v797_v7 = vld [vmem:[#allocation4 + $0x15f8] sm:$0xff]  ;;  %v427_v56 = vld [vmem:[#allocation4 + $0xa68] sm:$0xff] }
 0x15e   :  { %2257 = vmatpush1.bf16.msra.mxu1 %v2256_v16  ;;  %v392_v16 = vld [vmem:[#allocation4 + $0x950] sm:$0xff]  ;;  %v429_v57 = vld [vmem:[#allocation4 + $0xa78] sm:$0xff] }
 0x15f   :  { %2641 = vmatpush1.bf16.msra.mxu0 %v2640_v17  ;;  %2259 = vmatprep.subr.bf16.mxu1 %v2258_v18  ;;  %v774_v17 = vld [vmem:[#allocation4 + $0x1540] sm:$0xff]  ;;  %v2662_v18 = vpack.c.bf16 %v777_v11, %v775_v10  ;;  %v2280_v24 = vpack.c.bf16 %v392_v16, %v390_v15  ;;  %v2298_v10 = vpack.c.bf16 %v413_v5, %v411_v4  ;;  %v796_v15 = vld [vmem:[#allocation4 + $0x15f0] sm:$0xff]  ;;  %v415_v16 = vld [vmem:[#allocation4 + $0xa08] sm:$0xff] }
 0x160   :  { %2643 = vmatprep.subr.bf16.mxu0 %v2642_v22  ;;  %v779_v22 = vld [vmem:[#allocation4 + $0x1568] sm:$0xff]  ;;  %v2664_v25 = vpack.c.bf16 %v776_v19, %v774_v17  ;;  %v410_v11 = vld [vmem:[#allocation4 + $0x9e0] sm:$0xff]  ;;  %v417_v17 = vld [vmem:[#allocation4 + $0xa18] sm:$0xff] }
 0x161   :  { %v801_v19 = vld [vmem:[#allocation4 + $0x1618] sm:$0xff]  ;;  %v431_v4 = vld [vmem:[#allocation4 + $0xa88] sm:$0xff] }
 0x162   :  { %2261 = vmatpush1.bf16.msra.mxu1 %v2260_v28  ;;  %v396_v28 = vld [vmem:[#allocation4 + $0x970] sm:$0xff]  ;;  %v433_v5 = vld [vmem:[#allocation4 + $0xa98] sm:$0xff] }
 0x163   :  { %2645 = vmatpush1.bf16.msra.mxu0 %v2644_v29  ;;  %2263 = vmatprep.subr.bf16.mxu1 %v2262_v30  ;;  %v778_v29 = vld [vmem:[#allocation4 + $0x1560] sm:$0xff]  ;;  %v2666_v30 = vpack.c.bf16 %v781_v23, %v779_v22  ;;  %v2284_v36 = vpack.c.bf16 %v396_v28, %v394_v27  ;;  %v2302_v22 = vpack.c.bf16 %v417_v17, %v415_v16  ;;  %v800_v27 = vld [vmem:[#allocation4 + $0x1610] sm:$0xff]  ;;  %v419_v28 = vld [vmem:[#allocation4 + $0xa28] sm:$0xff] }
 0x164   :  { %2647 = vmatprep.subr.bf16.mxu0 %v2646_v34  ;;  %v783_v34 = vld [vmem:[#allocation4 + $0x1588] sm:$0xff]  ;;  %v2668_v37 = vpack.c.bf16 %v780_v31, %v778_v29  ;;  %v414_v23 = vld [vmem:[#allocation4 + $0xa00] sm:$0xff]  ;;  %v421_v29 = vld [vmem:[#allocation4 + $0xa38] sm:$0xff] }
 0x165   :  { %v805_v31 = vld [vmem:[#allocation4 + $0x1638] sm:$0xff]  ;;  %v435_v16 = vld [vmem:[#allocation4 + $0xaa8] sm:$0xff] }
 0x166   :  { %2265 = vmatpush1.bf16.msra.mxu1 %v2264_v40  ;;  %v400_v40 = vld [vmem:[#allocation4 + $0x990] sm:$0xff]  ;;  %v437_v17 = vld [vmem:[#allocation4 + $0xab8] sm:$0xff] }
 0x167   :  { %2649 = vmatpush1.bf16.msra.mxu0 %v2648_v41  ;;  %2267 = vmatprep.subr.bf16.mxu1 %v2266_v42  ;;  %v782_v41 = vld [vmem:[#allocation4 + $0x1580] sm:$0xff]  ;;  %v2670_v42 = vpack.c.bf16 %v785_v35, %v783_v34  ;;  %v2288_v48 = vpack.c.bf16 %v400_v40, %v398_v39  ;;  %v89_v34 = vld [vmem:[#allocation2 + $0xa0] sm:$0xff] }
 0x168   :  { %2651 = vmatprep.subr.bf16.mxu0 %v2650_v46  ;;  %v787_v46 = vld [vmem:[#allocation4 + $0x15a8] sm:$0xff]  ;;  %v2672_v49 = vpack.c.bf16 %v784_v43, %v782_v41  ;;  %v802_v39 = vld [vmem:[#allocation4 + $0x1620] sm:$0xff]  ;;  %v804_v41 = vld [vmem:[#allocation4 + $0x1630] sm:$0xff] }
 0x169   :  { %v425_v43 = vld [vmem:[#allocation4 + $0xa58] sm:$0xff] }
 0x16a   :  { %2269 = vmatpush1.bf16.msra.mxu1 %v2268_v52  ;;  %v404_v52 = vld [vmem:[#allocation4 + $0x9b0] sm:$0xff] }
 0x16b   :  { %2653 = vmatpush1.bf16.msra.mxu0 %v2652_v53  ;;  %2271 = vmatprep.subr.bf16.mxu1 %v2270_v54  ;;  %v786_v53 = vld [vmem:[#allocation4 + $0x15a0] sm:$0xff]  ;;  %v2674_v54 = vpack.c.bf16 %v789_v47, %v787_v46  ;;  %v2292_v60 = vpack.c.bf16 %v404_v52, %v402_v51  ;;  %v80_v46 = vld [vmem:[#allocation2 + $0x58] sm:$0xff] }
 0x16c   :  { %2655 = vmatprep.subr.bf16.mxu0 %v2654_v58  ;;  %v791_v58 = vld [vmem:[#allocation4 + $0x15c8] sm:$0xff]  ;;  %v2676_v61 = vpack.c.bf16 %v788_v55, %v786_v53  ;;  %v422_v51 = vld [vmem:[#allocation4 + $0xa40] sm:$0xff]  ;;  %v424_v52 = vld [vmem:[#allocation4 + $0xa50] sm:$0xff] }
 0x16d   :  { %v806_v53 = vld [vmem:[#allocation4 + $0x1640] sm:$0xff]  ;;  %v808_v55 = vld [vmem:[#allocation4 + $0x1650] sm:$0xff] }
 0x16e   :  { %2273 = vmatpush1.bf16.msra.mxu1 %v2272_v0  ;;  %v408_v0 = vld [vmem:[#allocation4 + $0x9d0] sm:$0xff] }
 0x16f   :  { %2657 = vmatpush1.bf16.msra.mxu0 %v2656_v1  ;;  %2275 = vmatprep.subr.bf16.mxu1 %v2274_v2  ;;  %v790_v1 = vld [vmem:[#allocation4 + $0x15c0] sm:$0xff]  ;;  %v2678_v2 = vpack.c.bf16 %v793_v59, %v791_v58  ;;  %v2296_v8 = vpack.c.bf16 %v408_v0, %v406_v63  ;;  %v811_v58 = vld [vmem:[#allocation4 + $0x1668] sm:$0xff]  ;;  %v813_v59 = vld [vmem:[#allocation4 + $0x1678] sm:$0xff] }
 0x170   :  { %2659 = vmatprep.subr.bf16.mxu0 %v2658_v6  ;;  %v795_v6 = vld [vmem:[#allocation4 + $0x15e8] sm:$0xff]  ;;  %v2680_v9 = vpack.c.bf16 %v792_v3, %v790_v1  ;;  %v426_v63 = vld [vmem:[#allocation4 + $0xa60] sm:$0xff]  ;;  %v428_v0 = vld [vmem:[#allocation4 + $0xa70] sm:$0xff] }
 0x171   :  { %v810_v1 = vld [vmem:[#allocation4 + $0x1660] sm:$0xff]  ;;  %v812_v3 = vld [vmem:[#allocation4 + $0x1670] sm:$0xff] }
 0x172   :  { %2277 = vmatpush1.bf16.msra.mxu1 %v2276_v12  ;;  %v412_v12 = vld [vmem:[#allocation4 + $0x9f0] sm:$0xff] }
 0x173   :  { %2661 = vmatpush1.bf16.msra.mxu0 %v2660_v13  ;;  %2279 = vmatprep.subr.bf16.mxu1 %v2278_v14  ;;  %v794_v13 = vld [vmem:[#allocation4 + $0x15e0] sm:$0xff]  ;;  %v2682_v14 = vpack.c.bf16 %v797_v7, %v795_v6  ;;  %v2300_v20 = vpack.c.bf16 %v412_v12, %v410_v11  ;;  %v815_v6 = vld [vmem:[#allocation4 + $0x1688] sm:$0xff]  ;;  %v817_v7 = vld [vmem:[#allocation4 + $0x1698] sm:$0xff] }
 0x174   :  { %2663 = vmatprep.subr.bf16.mxu0 %v2662_v18  ;;  %v799_v18 = vld [vmem:[#allocation4 + $0x1608] sm:$0xff]  ;;  %v2684_v21 = vpack.c.bf16 %v796_v15, %v794_v13  ;;  %v430_v11 = vld [vmem:[#allocation4 + $0xa80] sm:$0xff]  ;;  %v432_v12 = vld [vmem:[#allocation4 + $0xa90] sm:$0xff] }
 0x175   :  { %v814_v13 = vld [vmem:[#allocation4 + $0x1680] sm:$0xff]  ;;  %v816_v15 = vld [vmem:[#allocation4 + $0x1690] sm:$0xff] }
 0x176   :  { %2281 = vmatpush1.bf16.msra.mxu1 %v2280_v24  ;;  %v416_v24 = vld [vmem:[#allocation4 + $0xa10] sm:$0xff] }
 0x177   :  { %2665 = vmatpush1.bf16.msra.mxu0 %v2664_v25  ;;  %2283 = vmatprep.subr.bf16.mxu1 %v2282_v26  ;;  %v798_v25 = vld [vmem:[#allocation4 + $0x1600] sm:$0xff]  ;;  %v2686_v26 = vpack.c.bf16 %v801_v19, %v799_v18  ;;  %v2304_v33 = vpack.c.bf16 %v416_v24, %v414_v23  ;;  %v819_v18 = vld [vmem:[#allocation4 + $0x16a8] sm:$0xff]  ;;  %v821_v19 = vld [vmem:[#allocation4 + $0x16b8] sm:$0xff] }
 0x178   :  { %2667 = vmatprep.subr.bf16.mxu0 %v2666_v30  ;;  %v803_v30 = vld [vmem:[#allocation4 + $0x1628] sm:$0xff]  ;;  %v2688_v35 = vpack.c.bf16 %v800_v27, %v798_v25  ;;  %v434_v23 = vld [vmem:[#allocation4 + $0xaa0] sm:$0xff]  ;;  %v436_v24 = vld [vmem:[#allocation4 + $0xab0] sm:$0xff] }
 0x179   :  { %v2690_v40 = vpack.c.bf16 %v805_v31, %v803_v30  ;;  %v818_v25 = vld [vmem:[#allocation4 + $0x16a0] sm:$0xff]  ;;  %v820_v27 = vld [vmem:[#allocation4 + $0x16b0] sm:$0xff]  ;;  %v823_v30 = vld [vmem:[#allocation4 + $0x16c8] sm:$0xff] }
 0x17a   :  { %2285 = vmatpush1.bf16.msra.mxu1 %v2284_v36  ;;  %v2306_v36 = vpack.c.bf16 %v421_v29, %v419_v28  ;;  %v439_v28 = vld [vmem:[#allocation4 + $0xac8] sm:$0xff]  ;;  %v441_v29 = vld [vmem:[#allocation4 + $0xad8] sm:$0xff] }
 0x17b   :  { %2669 = vmatpush1.bf16.msra.mxu0 %v2668_v37  ;;  %2287 = vmatprep.subr.bf16.mxu1 %v2286_v38  ;;  %v418_v37 = vld [vmem:[#allocation4 + $0xa20] sm:$0xff]  ;;  %v420_v38 = vld [vmem:[#allocation4 + $0xa30] sm:$0xff]  ;;  %v825_v31 = vld [vmem:[#allocation4 + $0x16d8] sm:$0xff] }
 0x17c   :  { %2671 = vmatprep.subr.bf16.mxu0 %v2670_v42  ;;  %v423_v42 = vld [vmem:[#allocation4 + $0xa48] sm:$0xff]  ;;  %v2308_v47 = vpack.c.bf16 %v420_v38, %v418_v37  ;;  %v822_v37 = vld [vmem:[#allocation4 + $0x16c0] sm:$0xff]  ;;  %v2710_v38 = vpack.c.bf16 %v825_v31, %v823_v30 }
 0x17d   :  { %v458_v31 = vld [vmem:[#allocation4 + $0xb60] sm:$0xff] }
 0x17e   :  { %2289 = vmatpush1.bf16.msra.mxu1 %v2288_v48  ;;  %v92_v48 = vld [vmem:[#allocation2 + $0xb8] sm:$0xff] }
 0x17f   :  { %2673 = vmatpush1.bf16.msra.mxu0 %v2672_v49  ;;  %2291 = vmatprep.subr.bf16.mxu1 %v2290_v50  ;;  %v2692_v49 = vpack.c.bf16 %v804_v41, %v802_v39  ;;  %v2310_v50 = vpack.c.bf16 %v425_v43, %v423_v42  ;;  %v824_v39 = vld [vmem:[#allocation4 + $0x16d0] sm:$0xff]  ;;  %v445_v41 = vld [vmem:[#allocation4 + $0xaf8] sm:$0xff]  ;;  %v827_v42 = vld [vmem:[#allocation4 + $0x16e8] sm:$0xff] }
 0x180   :  { %2675 = vmatprep.subr.bf16.mxu0 %v2674_v54  ;;  %v2694_v54 = vpack.c.bf16 %v809_v45, %v807_v44  ;;  %v829_v43 = vld [vmem:[#allocation4 + $0x16f8] sm:$0xff]  ;;  %v2712_v45 = vpack.c.bf16 %v824_v39, %v822_v37 }
 0x181   :  { %v465_v37 = vld [vmem:[#allocation4 + $0xb98] sm:$0xff] }
 0x182   :  { %2293 = vmatpush1.bf16.msra.mxu1 %v2292_v60  ;;  %v2312_v60 = vpack.c.bf16 %v424_v52, %v422_v51  ;;  %v828_v51 = vld [vmem:[#allocation4 + $0x16f0] sm:$0xff]  ;;  %v447_v52 = vld [vmem:[#allocation4 + $0xb08] sm:$0xff]  ;;  %v849_v39 = vld [vmem:[#allocation4 + $0x1798] sm:$0xff] }
 0x183   :  { %2677 = vmatpush1.bf16.msra.mxu0 %v2676_v61  ;;  %2295 = vmatprep.subr.bf16.mxu1 %v2294_v62  ;;  %v2696_v61 = vpack.c.bf16 %v808_v55, %v806_v53  ;;  %v2314_v62 = vpack.c.bf16 %v429_v57, %v427_v56  ;;  %v449_v53 = vld [vmem:[#allocation4 + $0xb18] sm:$0xff] }
 0x184   :  { %2679 = vmatprep.subr.bf16.mxu0 %v2678_v2  ;;  %v2698_v2 = vpack.c.bf16 %v813_v59, %v811_v58  ;;  %v833_v55 = vld [vmem:[#allocation4 + $0x1718] sm:$0xff]  ;;  %v2334_v58 = vpack.c.bf16 %v449_v53, %v447_v52  ;;  %v446_v59 = vld [vmem:[#allocation4 + $0xb00] sm:$0xff] }
 0x186   :  { %2297 = vmatpush1.bf16.msra.mxu1 %v2296_v8  ;;  %v2316_v8 = vpack.c.bf16 %v428_v0, %v426_v63  ;;  %v832_v63 = vld [vmem:[#allocation4 + $0x1710] sm:$0xff]  ;;  %v451_v0 = vld [vmem:[#allocation4 + $0xb28] sm:$0xff] }
 0x187   :  { %2681 = vmatpush1.bf16.msra.mxu0 %v2680_v9  ;;  %2299 = vmatprep.subr.bf16.mxu1 %v2298_v10  ;;  %v2700_v9 = vpack.c.bf16 %v812_v3, %v810_v1  ;;  %v2318_v10 = vpack.c.bf16 %v433_v5, %v431_v4  ;;  %v453_v1 = vld [vmem:[#allocation4 + $0xb38] sm:$0xff] }
 0x188   :  { %2683 = vmatprep.subr.bf16.mxu0 %v2682_v14  ;;  %v2702_v14 = vpack.c.bf16 %v817_v7, %v815_v6  ;;  %v837_v3 = vld [vmem:[#allocation4 + $0x1738] sm:$0xff]  ;;  %v2338_v6 = vpack.c.bf16 %v453_v1, %v451_v0  ;;  %v450_v7 = vld [vmem:[#allocation4 + $0xb20] sm:$0xff] }
 0x18a   :  { %2301 = vmatpush1.bf16.msra.mxu1 %v2300_v20  ;;  %v2320_v20 = vpack.c.bf16 %v432_v12, %v430_v11  ;;  %v836_v11 = vld [vmem:[#allocation4 + $0x1730] sm:$0xff]  ;;  %v455_v12 = vld [vmem:[#allocation4 + $0xb48] sm:$0xff] }
 0x18b   :  { %2685 = vmatpush1.bf16.msra.mxu0 %v2684_v21  ;;  %2303 = vmatprep.subr.bf16.mxu1 %v2302_v22  ;;  %v2704_v21 = vpack.c.bf16 %v816_v15, %v814_v13  ;;  %v2322_v22 = vpack.c.bf16 %v437_v17, %v435_v16  ;;  %v457_v13 = vld [vmem:[#allocation4 + $0xb58] sm:$0xff] }
 0x18c   :  { %2687 = vmatprep.subr.bf16.mxu0 %v2686_v26  ;;  %v2706_v26 = vpack.c.bf16 %v821_v19, %v819_v18  ;;  %v841_v15 = vld [vmem:[#allocation4 + $0x1758] sm:$0xff]  ;;  %v2342_v18 = vpack.c.bf16 %v457_v13, %v455_v12  ;;  %v454_v19 = vld [vmem:[#allocation4 + $0xb40] sm:$0xff] }
 0x18d   :  { %1242 = vmatmul.mubr.f32.vlgmr.msra.gmra.mrb[0].mxu1 %v77_v32  ;;  %v2324_v32 = vpack.c.bf16 %v436_v24, %v434_v23  ;;  %v840_v23 = vld [vmem:[#allocation4 + $0x1750] sm:$0xff]  ;;  %v459_v24 = vld [vmem:[#allocation4 + $0xb68] sm:$0xff] }
 0x18e   :  { %2305 = vmatpush1.bf16.msra.mxu1 %v2304_v33  ;;  %1668 = vmatmul.mubr.f32.vlgmr.msra.gmra.mrb[0].mxu0 %v89_v34  ;;  %v2708_v33 = vpack.c.bf16 %v820_v27, %v818_v25  ;;  %v2326_v34 = vpack.c.bf16 %v441_v29, %v439_v28  ;;  %v461_v25 = vld [vmem:[#allocation4 + $0xb78] sm:$0xff] }
 0x18f   :  { %2689 = vmatpush1.bf16.msra.mxu0 %v2688_v35  ;;  %2307 = vmatprep.subr.bf16.mxu1 %v2306_v36  ;;  %v438_v35 = vld [vmem:[#allocation4 + $0xac0] sm:$0xff]  ;;  %v440_v36 = vld [vmem:[#allocation4 + $0xad0] sm:$0xff]  ;;  %v845_v27 = vld [vmem:[#allocation4 + $0x1778] sm:$0xff]  ;;  %v2346_v30 = vpack.c.bf16 %v461_v25, %v459_v24 }
 0x190   :  { %2691 = vmatprep.subr.bf16.mxu0 %v2690_v40  ;;  %1312 = vmatprep.mubr.f32.mxu1 %v80_v46  ;;  %v443_v40 = vld [vmem:[#allocation4 + $0xae8] sm:$0xff]  ;;  %v2328_v44 = vpack.c.bf16 %v440_v36, %v438_v35  ;;  %v844_v35 = vld [vmem:[#allocation4 + $0x1770] sm:$0xff] }
 0x191   :  { %1738 = vmatprep.mubr.f32.mxu0 %v92_v48  ;;  %v2330_v46 = vpack.c.bf16 %v445_v41, %v443_v40  ;;  %v444_v48 = vld [vmem:[#allocation4 + $0xaf0] sm:$0xff]  ;;  %v463_v36 = vld [vmem:[#allocation4 + $0xb88] sm:$0xff] }
 0x192   :  { %2309 = vmatpush1.bf16.msra.mxu1 %v2308_v47  ;;  %v442_v47 = vld [vmem:[#allocation4 + $0xae0] sm:$0xff] }
 0x193   :  { %2693 = vmatpush1.bf16.msra.mxu0 %v2692_v49  ;;  %2311 = vmatprep.subr.bf16.mxu1 %v2310_v50  ;;  %v826_v49 = vld [vmem:[#allocation4 + $0x16e0] sm:$0xff]  ;;  %v2714_v50 = vpack.c.bf16 %v829_v43, %v827_v42  ;;  %v2332_v56 = vpack.c.bf16 %v444_v48, %v442_v47  ;;  %v2350_v42 = vpack.c.bf16 %v465_v37, %v463_v36  ;;  %v848_v47 = vld [vmem:[#allocation4 + $0x1790] sm:$0xff]  ;;  %v467_v48 = vld [vmem:[#allocation4 + $0xba8] sm:$0xff] }
 0x194   :  { %2695 = vmatprep.subr.bf16.mxu0 %v2694_v54  ;;  %v831_v54 = vld [vmem:[#allocation4 + $0x1708] sm:$0xff]  ;;  %v2716_v57 = vpack.c.bf16 %v828_v51, %v826_v49  ;;  %v462_v43 = vld [vmem:[#allocation4 + $0xb80] sm:$0xff]  ;;  %v469_v49 = vld [vmem:[#allocation4 + $0xbb8] sm:$0xff] }
 0x195   :  { %v853_v51 = vld [vmem:[#allocation4 + $0x17b8] sm:$0xff]  ;;  %v79_v36 = vld [vmem:[#allocation2 + $0x50] sm:$0xff] }
 0x196   :  { %2313 = vmatpush1.bf16.msra.mxu1 %v2312_v60  ;;  %v448_v60 = vld [vmem:[#allocation4 + $0xb10] sm:$0xff]  ;;  %v91_v37 = vld [vmem:[#allocation2 + $0xb0] sm:$0xff] }
 0x197   :  { %2697 = vmatpush1.bf16.msra.mxu0 %v2696_v61  ;;  %2315 = vmatprep.subr.bf16.mxu1 %v2314_v62  ;;  %v830_v61 = vld [vmem:[#allocation4 + $0x1700] sm:$0xff]  ;;  %v2718_v62 = vpack.c.bf16 %v833_v55, %v831_v54  ;;  %v2336_v4 = vpack.c.bf16 %v448_v60, %v446_v59  ;;  %v2354_v54 = vpack.c.bf16 %v469_v49, %v467_v48  ;;  %v852_v59 = vld [vmem:[#allocation4 + $0x17b0] sm:$0xff]  ;;  %v471_v60 = vld [vmem:[#allocation4 + $0xbc8] sm:$0xff] }
 0x198   :  { %2699 = vmatprep.subr.bf16.mxu0 %v2698_v2  ;;  %v835_v2 = vld [vmem:[#allocation4 + $0x1728] sm:$0xff]  ;;  %v2720_v5 = vpack.c.bf16 %v832_v63, %v830_v61  ;;  %v466_v55 = vld [vmem:[#allocation4 + $0xba0] sm:$0xff]  ;;  %v473_v61 = vld [vmem:[#allocation4 + $0xbd8] sm:$0xff] }
 0x199   :  { %v857_v63 = vld [vmem:[#allocation4 + $0x17d8] sm:$0xff] }
 0x19a   :  { %2317 = vmatpush1.bf16.msra.mxu1 %v2316_v8  ;;  %v452_v8 = vld [vmem:[#allocation4 + $0xb30] sm:$0xff] }
 0x19b   :  { %2701 = vmatpush1.bf16.msra.mxu0 %v2700_v9  ;;  %2319 = vmatprep.subr.bf16.mxu1 %v2318_v10  ;;  %v834_v9 = vld [vmem:[#allocation4 + $0x1720] sm:$0xff]  ;;  %v2722_v10 = vpack.c.bf16 %v837_v3, %v835_v2  ;;  %v2340_v16 = vpack.c.bf16 %v452_v8, %v450_v7  ;;  %v2358_v2 = vpack.c.bf16 %v473_v61, %v471_v60  ;;  %v856_v7 = vld [vmem:[#allocation4 + $0x17d0] sm:$0xff]  ;;  %v475_v8 = vld [vmem:[#allocation4 + $0xbe8] sm:$0xff] }
 0x19c   :  { %2703 = vmatprep.subr.bf16.mxu0 %v2702_v14  ;;  %v839_v14 = vld [vmem:[#allocation4 + $0x1748] sm:$0xff]  ;;  %v2724_v17 = vpack.c.bf16 %v836_v11, %v834_v9  ;;  %v470_v3 = vld [vmem:[#allocation4 + $0xbc0] sm:$0xff]  ;;  %v477_v9 = vld [vmem:[#allocation4 + $0xbf8] sm:$0xff] }
 0x19d   :  { %v861_v11 = vld [vmem:[#allocation4 + $0x17f8] sm:$0xff]  ;;  %v1824_v60 = vld [vmem:[%s3121_s3 + $0x30] sm:$0xff]  ;;  %v1825_v61 = vld [vmem:[%s3121_s3 + $0x38] sm:$0xff] }
 0x19e   :  { %2321 = vmatpush1.bf16.msra.mxu1 %v2320_v20  ;;  %v456_v20 = vld [vmem:[#allocation4 + $0xb50] sm:$0xff] }
 0x19f   :  { %2705 = vmatpush1.bf16.msra.mxu0 %v2704_v21  ;;  %2323 = vmatprep.subr.bf16.mxu1 %v2322_v22  ;;  %v838_v21 = vld [vmem:[#allocation4 + $0x1740] sm:$0xff]  ;;  %v2726_v22 = vpack.c.bf16 %v841_v15, %v839_v14  ;;  %v2344_v28 = vpack.c.bf16 %v456_v20, %v454_v19  ;;  %v2362_v14 = vpack.c.bf16 %v477_v9, %v475_v8  ;;  %v860_v19 = vld [vmem:[#allocation4 + $0x17f0] sm:$0xff]  ;;  %v1834_v20 = vld [vmem:[%s3121_s3 + $0x80] sm:$0xff] }
 0x1a0   :  { %2707 = vmatprep.subr.bf16.mxu0 %v2706_v26  ;;  %v843_v26 = vld [vmem:[#allocation4 + $0x1768] sm:$0xff]  ;;  %v2728_v29 = vpack.c.bf16 %v840_v23, %v838_v21  ;;  %v474_v15 = vld [vmem:[#allocation4 + $0xbe0] sm:$0xff]  ;;  %v865_v23 = vld [vmem:[#allocation4 + $0x1818] sm:$0xff] }
 0x1a1   :  { %v1835_v21 = vld [vmem:[%s3121_s3 + $0x88] sm:$0xff]  ;;  %v1828_v8 = vld [vmem:[%s3121_s3 + $0x50] sm:$0xff]  ;;  %v1829_v9 = vld [vmem:[%s3121_s3 + $0x58] sm:$0xff] }
 0x1a2   :  { %2325 = vmatpush1.bf16.msra.mxu1 %v2324_v32  ;;  %v460_v32 = vld [vmem:[#allocation4 + $0xb70] sm:$0xff] }
 0x1a3   :  { %2709 = vmatpush1.bf16.msra.mxu0 %v2708_v33  ;;  %2327 = vmatprep.subr.bf16.mxu1 %v2326_v34  ;;  %v842_v33 = vld [vmem:[#allocation4 + $0x1760] sm:$0xff]  ;;  %v2730_v34 = vpack.c.bf16 %v845_v27, %v843_v26  ;;  %v2348_v40 = vpack.c.bf16 %v460_v32, %v458_v31  ;;  %v2760_v26 = vpack.c.bf16 %v1835_v21, %v1834_v20  ;;  %v1818_v27 = vld [vmem:[%s3121_s3] sm:$0xff]  ;;  %v864_v31 = vld [vmem:[#allocation4 + $0x1810] sm:$0xff] }
 0x1a4   :  { %2711 = vmatprep.subr.bf16.mxu0 %v2710_v38  ;;  %v847_v38 = vld [vmem:[#allocation4 + $0x1788] sm:$0xff]  ;;  %v2732_v41 = vpack.c.bf16 %v844_v35, %v842_v33  ;;  %v869_v33 = vld [vmem:[#allocation4 + $0x1838] sm:$0x7]  ;;  %v1837_v35 = vld [vmem:[%s3121_s3 + $0x98] sm:$0xff] }
 0x1a5   :  { %v867_v32 = vld [vmem:[#allocation4 + $0x1828] sm:$0xff]  ;;  %v1833_v21 = vld [vmem:[%s3121_s3 + $0x78] sm:$0xff] }
 0x1a6   :  { %2329 = vmatpush1.bf16.msra.mxu1 %v2328_v44  ;;  %v464_v44 = vld [vmem:[#allocation4 + $0xb90] sm:$0xff]  ;;  %v1832_v20 = vld [vmem:[%s3121_s3 + $0x70] sm:$0xff] }
 0x1a7   :  { %2713 = vmatpush1.bf16.msra.mxu0 %v2712_v45  ;;  %2331 = vmatprep.subr.bf16.mxu1 %v2330_v46  ;;  %v846_v45 = vld [vmem:[#allocation4 + $0x1780] sm:$0xff]  ;;  %v2734_v46 = vpack.c.bf16 %v849_v39, %v847_v38  ;;  %v2352_v52 = vpack.c.bf16 %v464_v44, %v462_v43  ;;  %v2754_v43 = vpack.c.bf16 %v869_v33, %v867_v32  ;;  %v868_v44 = vld [vmem:[#allocation4 + $0x1830] sm:$0x7] }
 0x1a8   :  { %2715 = vmatprep.subr.bf16.mxu0 %v2714_v50  ;;  %v851_v50 = vld [vmem:[#allocation4 + $0x17a8] sm:$0xff]  ;;  %v2736_v53 = vpack.c.bf16 %v848_v47, %v846_v45  ;;  %v1839_v47 = vld [vmem:[%s3121_s3 + $0xa8] sm:$0xff] }
 0x1aa   :  { %2333 = vmatpush1.bf16.msra.mxu1 %v2332_v56  ;;  %v468_v56 = vld [vmem:[#allocation4 + $0xbb0] sm:$0xff] }
 0x1ab   :  { %2717 = vmatpush1.bf16.msra.mxu0 %v2716_v57  ;;  %2335 = vmatprep.subr.bf16.mxu1 %v2334_v58  ;;  %v850_v57 = vld [vmem:[#allocation4 + $0x17a0] sm:$0xff]  ;;  %v2738_v58 = vpack.c.bf16 %v853_v51, %v851_v50  ;;  %v2356_v0 = vpack.c.bf16 %v468_v56, %v466_v55  ;;  %v2931_v51 = vmov 0.0   ;;  %v1840_v55 = vld [vmem:[%s3121_s3 + $0xb0] sm:$0xff]  ;;  %v1841_v56 = vld [vmem:[%s3121_s3 + $0xb8] sm:$0xff] }
 0x1ac   :  { %2719 = vmatprep.subr.bf16.mxu0 %v2718_v62  ;;  %v855_v62 = vld [vmem:[#allocation4 + $0x17c8] sm:$0xff]  ;;  %v2740_v1 = vpack.c.bf16 %v852_v59, %v850_v57  ;;  %v2772_v59 = vpack.c.bf16 %v1841_v56, %v1840_v55 }
 0x1ae   :  { %2337 = vmatpush1.bf16.msra.mxu1 %v2336_v4  ;;  %v472_v4 = vld [vmem:[#allocation4 + $0xbd0] sm:$0xff] }
 0x1af   :  { %2721 = vmatpush1.bf16.msra.mxu0 %v2720_v5  ;;  %2339 = vmatprep.subr.bf16.mxu1 %v2338_v6  ;;  %v854_v5 = vld [vmem:[#allocation4 + $0x17c0] sm:$0xff]  ;;  %v2742_v6 = vpack.c.bf16 %v857_v63, %v855_v62  ;;  %v2360_v12 = vpack.c.bf16 %v472_v4, %v470_v3  ;;  %v1842_v62 = vld [vmem:[%s3121_s3 + $0xc0] sm:$0xff] }
 0x1b0   :  { %2723 = vmatprep.subr.bf16.mxu0 %v2722_v10  ;;  %v859_v10 = vld [vmem:[#allocation4 + $0x17e8] sm:$0xff]  ;;  %v2744_v13 = vpack.c.bf16 %v856_v7, %v854_v5  ;;  %v1843_v63 = vld [vmem:[%s3121_s3 + $0xc8] sm:$0xff] }
 0x1b1   :  { %v1827_v3 = vld [vmem:[%s3121_s3 + $0x48] sm:$0xff]  ;;  %v1844_v5 = vld [vmem:[%s3121_s3 + $0xd0] sm:$0xff] }
 0x1b2   :  { %2341 = vmatpush1.bf16.msra.mxu1 %v2340_v16  ;;  %v476_v16 = vld [vmem:[#allocation4 + $0xbf0] sm:$0xff] }
 0x1b3   :  { %2725 = vmatpush1.bf16.msra.mxu0 %v2724_v17  ;;  %2343 = vmatprep.subr.bf16.mxu1 %v2342_v18  ;;  %v858_v17 = vld [vmem:[#allocation4 + $0x17e0] sm:$0xff]  ;;  %v2746_v18 = vpack.c.bf16 %v861_v11, %v859_v10  ;;  %v2364_v24 = vpack.c.bf16 %v476_v16, %v474_v15  ;;  %v1846_v10 = vld [vmem:[%s3121_s3 + $0xe0] sm:$0xff]  ;;  %v2782_v11 = vpack.c.bf16 %v1829_v9, %v1828_v8 }
 0x1b4   :  { %2727 = vmatprep.subr.bf16.mxu0 %v2726_v22  ;;  %v863_v22 = vld [vmem:[#allocation4 + $0x1808] sm:$0xff]  ;;  %v2748_v25 = vpack.c.bf16 %v860_v19, %v858_v17  ;;  %v1831_v15 = vld [vmem:[%s3121_s3 + $0x68] sm:$0xff] }
 0x1b5   :  { %v1848_v17 = vld [vmem:[%s3121_s3 + $0xf0] sm:$0xff] }
 0x1b6   :  { %2345 = vmatpush1.bf16.msra.mxu1 %v2344_v28  ;;  %v1819_v28 = vld [vmem:[%s3121_s3 + $0x8] sm:$0xff] }
 0x1b7   :  { %2729 = vmatpush1.bf16.msra.mxu0 %v2728_v29  ;;  %2347 = vmatprep.subr.bf16.mxu1 %v2346_v30  ;;  %v2750_v29 = vpack.c.bf16 %v865_v23, %v863_v22  ;;  %v862_v30 = vld [vmem:[#allocation4 + $0x1800] sm:$0xff]  ;;  %v2762_v38 = vpack.c.bf16 %v1819_v28, %v1818_v27  ;;  %v2790_v22 = vpack.c.bf16 %v1833_v21, %v1832_v20  ;;  %v872_v23 = vlaneseq }
 0x1b8   :  { %2731 = vmatprep.subr.bf16.mxu0 %v2730_v34  ;;  %v1836_v34 = vld [vmem:[%s3121_s3 + $0x90] sm:$0xff]  ;;  %v2752_v39 = vpack.c.bf16 %v864_v31, %v862_v30  ;;  %v870_v27 = vld [vmem:[#allocation6] sm:$0x3] }
 0x1b9   :  { %v2764_v45 = vpack.c.bf16 %v1837_v35, %v1836_v34 }
 0x1ba   :  { %2349 = vmatpush1.bf16.msra.mxu1 %v2348_v40  ;;  %v866_v40 = vld [vmem:[#allocation4 + $0x1820] sm:$0xff] }
 0x1bb   :  { %2733 = vmatpush1.bf16.msra.mxu0 %v2732_v41  ;;  %2351 = vmatprep.subr.bf16.mxu1 %v2350_v42  ;;  %v1820_v41 = vld [vmem:[%s3121_s3 + $0x10] sm:$0xff]  ;;  %v1821_v42 = vld [vmem:[%s3121_s3 + $0x18] sm:$0xff]  ;;  %v2757_v50 = vpack.c.bf16 %v868_v44, %v866_v40 }
 0x1bc   :  { %2735 = vmatprep.subr.bf16.mxu0 %v2734_v46  ;;  %v1838_v46 = vld [vmem:[%s3121_s3 + $0xa0] sm:$0xff]  ;;  %v2766_v49 = vpack.c.bf16 %v1821_v42, %v1820_v41  ;;  %v1945_v41 = vld [vmem:[#allocation7] ss:$0 sm:$0xff] }
 0x1be   :  { %2353 = vmatpush1.bf16.msra.mxu1 %v2352_v52  ;;  %v2768_v52 = vpack.c.bf16 %v1839_v47, %v1838_v46 }
 0x1bf   :  { %2737 = vmatpush1.bf16.msra.mxu0 %v2736_v53  ;;  %2355 = vmatprep.subr.bf16.mxu1 %v2354_v54  ;;  %v1822_v53 = vld [vmem:[%s3121_s3 + $0x20] sm:$0xff]  ;;  %v1823_v54 = vld [vmem:[%s3121_s3 + $0x28] sm:$0xff] }
 0x1c0   :  { %2739 = vmatprep.subr.bf16.mxu0 %v2738_v58  ;;  %v2770_v57 = vpack.c.bf16 %v1823_v54, %v1822_v53  ;;  %v93_v58 = vld [vmem:[#allocation2 + $0xc0] sm:$0xff] }
 0x1c2   :  { %2357 = vmatpush1.bf16.msra.mxu1 %v2356_v0  ;;  %v2774_v0 = vpack.c.bf16 %v1825_v61, %v1824_v60 }
 0x1c3   :  { %2741 = vmatpush1.bf16.msra.mxu0 %v2740_v1  ;;  %2359 = vmatprep.subr.bf16.mxu1 %v2358_v2  ;;  %v2776_v1 = vpack.c.bf16 %v1843_v63, %v1842_v62  ;;  %v1826_v2 = vld [vmem:[%s3121_s3 + $0x40] sm:$0xff] }
 0x1c4   :  { %2743 = vmatprep.subr.bf16.mxu0 %v2742_v6  ;;  %v2778_v4 = vpack.c.bf16 %v1827_v3, %v1826_v2  ;;  %v1845_v6 = vld [vmem:[%s3121_s3 + $0xd8] sm:$0xff] }
 0x1c5   :  { %v2780_v7 = vpack.c.bf16 %v1845_v6, %v1844_v5 }
 0x1c6   :  { %2361 = vmatpush1.bf16.msra.mxu1 %v2360_v12  ;;  %v1847_v12 = vld [vmem:[%s3121_s3 + $0xe8] sm:$0xff] }
 0x1c7   :  { %2745 = vmatpush1.bf16.msra.mxu0 %v2744_v13  ;;  %2363 = vmatprep.subr.bf16.mxu1 %v2362_v14  ;;  %v2784_v13 = vpack.c.bf16 %v1847_v12, %v1846_v10  ;;  %v1830_v14 = vld [vmem:[%s3121_s3 + $0x60] sm:$0xff] }
 0x1c8   :  { %2747 = vmatprep.subr.bf16.mxu0 %v2746_v18  ;;  %v2786_v16 = vpack.c.bf16 %v1831_v15, %v1830_v14  ;;  %v1849_v18 = vld [vmem:[%s3121_s3 + $0xf8] sm:$0xff] }
 0x1c9   :  { %v2788_v19 = vpack.c.bf16 %v1849_v18, %v1848_v17 }
 0x1ca   :  { %2365 = vmatpush1.bf16.msra.mxu1 %v2364_v24  ;;  %v873_v24 = vshrl.u32 %v872_v23, 7 }
 0x1cb   :  { %2749 = vmatpush1.bf16.msra.mxu0 %v2748_v25  ;;  %2761 = vmatprep.subr.bf16.mxu1 %v2760_v26 }
 0x1cc   :  { %2751 = vmatprep.subr.bf16.mxu0 %v2750_v29  ;;  %v874_v25 = vsub.s32 0, %v873_v24  ;;  %v878_v28 = vsub.s32 1, %v873_v24 }
 0x1cd   :  { %1313 = vmatmul.mubr.f32.vlgmr.msra.gmra.mrb[0].mxu1 %v79_v36 }
 0x1ce   :  { %1739 = vmatmul.mubr.f32.vlgmr.msra.gmra.mrb[0].mxu0 %v91_v37  ;;  %2763 = vmatpush3.bf16.msra.mxu1 %v2762_v38  ;;  %v875_v30 = vrot.slane %v870_v27, %v874_v25  ;;  %v879_v31 = vrot.slane %v870_v27, %v878_v28 }
 0x1cf   :  { %2753 = vmatpush1.bf16.msra.mxu0 %v2752_v39  ;;  %1809 = vmatprep.mubr.f32.mxu0 %v2931_v51 }
 0x1d0   :  { %2756 = vmatprep.subr.msk.bf16.mxu0 %vm3041_vm2, %v2754_v43  ;;  %2765 = vmatprep.subr.bf16.mxu1 %v2764_v45 }
 0x1d2   :  { %2767 = vmatpush3.bf16.msra.mxu1 %v2766_v49 }
 0x1d3   :  { %2759 = vmatpush1.bf16.msk.msra.mxu0 %vm3041_vm2, %v2757_v50  ;;  %2769 = vmatprep.subr.bf16.mxu1 %v2768_v52 }
 0x1d6   :  { %1944 = vmatmul.mubr.msk.f32.vlgmr.msra.gmra.mrb[0].mxu0 %vm882_vm3, %v93_v58  ;;  %2771 = vmatpush3.bf16.msra.mxu1 %v2770_v57 }
 0x1d7   :  { %2773 = vmatprep.subr.bf16.mxu1 %v2772_v59 }
 0x1da   :  { %2775 = vmatpush3.bf16.msra.mxu1 %v2774_v0 }
 0x1db   :  { %2777 = vmatprep.subr.bf16.mxu1 %v2776_v1 }
 0x1de   :  { %2779 = vmatpush3.bf16.msra.mxu1 %v2778_v4 }
 0x1df   :  { %2781 = vmatprep.subr.bf16.mxu1 %v2780_v7 }
 0x1e2   :  { %2783 = vmatpush3.bf16.msra.mxu1 %v2782_v11 }
 0x1e3   :  { %2785 = vmatprep.subr.bf16.mxu1 %v2784_v13 }
 0x1e6   :  { %2787 = vmatpush3.bf16.msra.mxu1 %v2786_v16 }
 0x1e7   :  { %2789 = vmatprep.subr.bf16.mxu1 %v2788_v19 }
 0x1ea   :  { %2791 = vmatpush3.bf16.msra.mxu1 %v2790_v22 }
 0x2a0   :  { %v1314_v26 = vpop.f32.mrb[0].mxu1 }
 0x2a1   :  { %v1316_v29 = vpop.f32.mrb[1].mxu1  ;;  %v2792_v32 = vadd.f32 %v1314_v26, %v875_v30 }
 0x2a2   :  { %v2794_v33 = vadd.f32 %v1316_v29, %v879_v31 }
 0x2a9   :  { %v1811_v34 = vpop.f32.mrb[0].mxu0 }
 0x2aa   :  { %v2793_v35 = vadd.f32 %v2792_v32, %v1811_v34  ;;  %v1813_v36 = vpop.f32.mrb[1].mxu0 }
 0x2ab   :  { %v2795_v37 = vadd.f32 %v2794_v33, %v1813_v36 }
 0x2ac   :  { %v1816_v39 = vmax.f32 %v2793_v35, 0.0 }
 0x2ad   :  { %v1817_v38 = vmax.f32 %v2795_v37, 0.0 }
 0x2af   :  { %1921 = vmatprep.mubr.f32.mxu1 %v1817_v38 }
 0x2b0   :  { %1922 = vmatmul.mubr.f32.vlgmr.msra.gmra.mrb[2].mxu1 %v1816_v39 }
 0x383   :  { %v1979_v40 = vpop.f32.mrb[2].mxu1 }
 0x384   :  { %v1980_v42 = vpop.f32.mrb[3].mxu1 }
 0x385   :  { %v1981_v43 = vadd.f32 %v1980_v42, %v1979_v40 }
 0x387   :  { %v1924_v44 = vadd.f32 %v1981_v43, %v1945_v41 }
 0x389   :  { %v1946_v45 = vmul.f32 -1.442695, %v1924_v44 }
 0x38b   :  { %2826 = vpow2.f32 %v1946_v45 }
 0x395   :  { %v2827_v46 = vpop.eup %2826 }
 0x396   :  { %v1930_v47 = vadd.f32 1.0, %v2827_v46 }
 0x398   :  { %2828 = vrcp.f32 %v1930_v47 }
 0x3a2   :  { %v2829_v48 = vpop.eup %2828 }
 0x3a3   :  { %1934 = vst.msk [vmem:[%s3123_s5] sm:$0xff] %vm1933_vm4, %v2829_v48 }
 0x3a4   :  { %1939 = vsyncpa [#allocation3], 1 }
 0x3a5   :  { %1940 = vsyncpa [#allocation5], 1 }
 0x3a6   :  { %1941 = vsyncpa [#allocation8], 1 }

</bundles_post_ra>
